<compile_context>
chip_gen: v5e
topology: v5e:2x2
jax: 0.10.0
libtpu: 0.0.40
codegen_flags: <defaults>
</compile_context>

<pallas_src>
import functools

import numpy as np
import jax
import jax.numpy as jnp
from jax import lax
from jax.experimental import pallas as pl
from jax.experimental.pallas import tpu as pltpu


def _norm_softmax_kernel(scale_ref, x_ref, out_ref,
                         row_m, row_s, col_m, col_s, acc, *, n):
    i = pl.program_id(0)          # row-tile index (outer)
    j = pl.program_id(1)          # col-tile index (inner)
    ni = pl.num_programs(0)
    nj = pl.num_programs(1)
    t = x_ref.shape[0]            # square tile size

    scale = scale_ref[0]          # 1 / temperature (f32, SMEM)

    # Upcast (supports bf16 input) and fold the temperature scale once per tile.
    xs = x_ref[...].astype(jnp.float32) * scale                 # (T, T)

    # ---- init accumulators --------------------------------------------------
    @pl.when(jnp.logical_and(i == 0, j == 0))
    def _():
        acc[...] = jnp.zeros_like(acc)

    @pl.when(j == 0)
    def _():
        row_m[...] = jnp.full_like(row_m, -jnp.inf)
        row_s[...] = jnp.zeros_like(row_s)

    @pl.when(i == 0)
    def _():
        col_m[j] = jnp.full((1, t), -jnp.inf, jnp.float32)
        col_s[j] = jnp.zeros((1, t), jnp.float32)

    # ---- online logsumexp over rows (softmax along axis=1) -------------------
    m_old = row_m[...]                                           # (T, 1)
    m_new = jnp.maximum(m_old, jnp.max(xs, axis=1, keepdims=True))
    p_row = jnp.exp(xs - m_new)                                  # (T, T)
    row_s[...] = row_s[...] * jnp.exp(m_old - m_new) + jnp.sum(
        p_row, axis=1, keepdims=True)
    row_m[...] = m_new

    # ---- online logsumexp over columns (softmax along axis=0) ----------------
    # Separate per-column shift kept for numerical robustness (two exp passes
    # per tile; the kernel is HBM-bound on v5e/v6e either way).
    cm_old = col_m[j]                                            # (1, T)
    cm_new = jnp.maximum(cm_old, jnp.max(xs, axis=0, keepdims=True))
    p_col = jnp.exp(xs - cm_new)                                 # (T, T)
    col_s[j] = col_s[j] * jnp.exp(cm_old - cm_new) + jnp.sum(
        p_col, axis=0, keepdims=True)
    col_m[j] = cm_new

    # ---- diagonal term: only diagonal tiles contain diagonal entries ---------
    @pl.when(i == j)
    def _():
        rid = lax.broadcasted_iota(jnp.int32, (t, t), 0)
        cid = lax.broadcasted_iota(jnp.int32, (t, t), 1)
        d = jnp.where(rid == cid, xs, 0.0)
        dsum = jnp.sum(jnp.sum(d, axis=1, keepdims=True), axis=0, keepdims=True)
        acc[...] = acc[...] - 2.0 * dsum

    # ---- finalize a row block once its last column tile was processed --------
    @pl.when(j == nj - 1)
    def _():
        row_lse = jnp.log(row_s[...]) + row_m[...]               # (T, 1)
        acc[...] = acc[...] + jnp.sum(row_lse, axis=0, keepdims=True)

    # ---- finalize a column block once its last row tile was processed --------
    @pl.when(i == ni - 1)
    def _():
        col_lse = jnp.log(col_s[j]) + col_m[j]                   # (1, T)
        acc[...] = acc[...] + jnp.sum(col_lse, axis=1, keepdims=True)

    # ---- single scalar store at the very last grid step -----------------------
    @pl.when(jnp.logical_and(i == ni - 1, j == nj - 1))
    def _():
        out_ref[...] = acc[...] * (1.0 / n)


def _pick_tile(n, block):
    # Square tiles so diagonal entries live only in (i == j) tiles.
    for cand in (block, 512, 256, 128):
        if 0 < cand <= n and n % cand == 0 and cand % 128 == 0:
            return cand
    return n  # small / irregular N -> single full-matrix block


def norm_softmax_loss(x, temperature=0.05, block=256):
    """x: [N, N] similarity matrix (f32 or bf16). Returns scalar f32 loss."""
    n = x.shape[0]
    assert x.ndim == 2 and x.shape[1] == n, "expects a square similarity matrix"
    t = _pick_tile(n, block)
    grid = (n // t, n // t)
    scale = jnp.asarray(1.0 / temperature, jnp.float32).reshape((1,))

    kernel = functools.partial(_norm_softmax_kernel, n=float(n))

    # TODO(synk): if x comes from text_emb @ image_emb.T upstream, fuse that
    # matmul here (stream (T,D) embedding tiles onto the MXU) so the N x N
    # logits never touch HBM.
    out = pl.pallas_call(
        kernel,
        out_shape=jax.ShapeDtypeStruct((1, 1), jnp.float32),
        grid_spec=pltpu.PrefetchScalarGridSpec(
            num_scalar_prefetch=0,
            grid=grid,
            in_specs=[
                pl.BlockSpec(memory_space=pltpu.MemorySpace.SMEM),  # scale
                pl.BlockSpec((t, t), lambda i, j: (i, j)),          # x tile
            ],
            out_specs=pl.BlockSpec((1, 1), lambda i, j: (0, 0)),
            scratch_shapes=[
                pltpu.VMEM((t, 1), jnp.float32),            # row max
                pltpu.VMEM((t, 1), jnp.float32),            # row sum
                pltpu.VMEM((grid[1], 1, t), jnp.float32),   # col max (per col block)
                pltpu.VMEM((grid[1], 1, t), jnp.float32),   # col sum (per col block)
                pltpu.VMEM((1, 1), jnp.float32),            # scalar loss accumulator
            ],
        ),
        compiler_params=pltpu.CompilerParams(
            # Row/col logsumexp accumulators are carried across both grid axes,
            # so both stay sequential on one TensorCore.
            # TODO(synk): v7x megacore - shard the row axis across the 2 TCs
            # with per-core partial accumulators + a tiny combine epilogue.
            dimension_semantics=("arbitrary", "arbitrary"),
            vmem_limit_bytes=32 * 1024 * 1024,
        ),
    )(scale, x)
    return out[0, 0]


def _reference_loss(x, temperature=0.05):
    # Pure-JAX mirror of the PyTorch NormSoftmaxLoss module.
    logits = x.astype(jnp.float32) / temperature
    n = x.shape[0]
    idx = jnp.arange(n)
    i_logsm = jax.nn.log_softmax(logits, axis=1)
    j_logsm = jax.nn.log_softmax(logits.T, axis=1)
    loss_i = jnp.mean(i_logsm[idx, idx])
    loss_j = jnp.mean(j_logsm[idx, idx])
    return -loss_i - loss_j


if __name__ == "__main__":
    temperature = 0.05

    # Tiled path: 256x256 similarity matrix with 128x128 tiles -> 2x2 grid,
    # exercising row/col online accumulation, diagonal tiles and finalization.
    x_big = jax.random.normal(jax.random.PRNGKey(0), (256, 256), dtype=jnp.float32)
    loss_big = jax.block_until_ready(norm_softmax_loss(x_big, temperature, block=128))
    ref_big = jax.block_until_ready(_reference_loss(x_big, temperature))
    assert jnp.allclose(loss_big, ref_big, rtol=1e-4, atol=1e-3), (loss_big, ref_big)

    # Small full-block fallback path (8x8 single tile).
    x_small = jax.random.normal(jax.random.PRNGKey(1), (8, 8), dtype=jnp.float32)
    loss_small = jax.block_until_ready(norm_softmax_loss(x_small, temperature))
    ref_small = jax.block_until_ready(_reference_loss(x_small, temperature))
    assert jnp.allclose(loss_small, ref_small, rtol=1e-4, atol=1e-3), (loss_small, ref_small)

    print("KERNEL_OK")
</pallas_src>

<mosaic_0001>
module attributes {stable_mosaic.version = 11 : i64} {
  func.func @_norm_softmax_kernel(%arg0: i32, %arg1: i32, %arg2: memref<1xf32, #tpu.memory_space<smem>>, %arg3: memref<128x128xf32, #tpu.memory_space<vmem>>, %arg4: memref<1x1xf32, #tpu.memory_space<vmem>>, %arg5: memref<128x1xf32, #tpu.memory_space<vmem>>, %arg6: memref<128x1xf32, #tpu.memory_space<vmem>>, %arg7: memref<2x1x128xf32, #tpu.memory_space<vmem>>, %arg8: memref<2x1x128xf32, #tpu.memory_space<vmem>>, %arg9: memref<1x1xf32, #tpu.memory_space<vmem>>) attributes {dimension_semantics = [#tpu.dimension_semantics<arbitrary>, #tpu.dimension_semantics<arbitrary>], iteration_bounds = array<i64: 2, 2>, scalar_prefetch = 0 : i64, scratch_operands = 5 : i64, tpu.core_type = #tpu.core_type<tc>, window_params = [{transform_indices = @transform_0, window_bounds = array<i64: 1>}, {transform_indices = @transform_1, window_bounds = array<i64: 128, 128>}, {pipeline_mode = #tpu.pipeline_mode<synchronous>, transform_indices = @transform_2, window_bounds = array<i64: 1, 1>}]} {
    %c0 = arith.constant 0 : index
    %0 = memref.load %arg2[%c0] : memref<1xf32, #tpu.memory_space<smem>>
    %c0_0 = arith.constant 0 : index
    %c0_1 = arith.constant 0 : index
    %1 = vector.load %arg3[%c0_0, %c0_1] : memref<128x128xf32, #tpu.memory_space<vmem>>, vector<128x128xf32>
    %2 = vector.broadcast %0 : f32 to vector<128x128xf32>
    %3 = arith.mulf %1, %2 : vector<128x128xf32>
    %c0_i32 = arith.constant 0 : i32
    %4 = arith.cmpi eq, %arg0, %c0_i32 : i32
    %c0_i32_2 = arith.constant 0 : i32
    %5 = arith.cmpi eq, %arg1, %c0_i32_2 : i32
    %6 = arith.andi %4, %5 : i1
    %7 = arith.extui %6 : i1 to i32
    %c0_i32_3 = arith.constant 0 : i32
    %8 = arith.cmpi ne, %7, %c0_i32_3 : i32
    scf.if %8 {
      %cst_34 = arith.constant 0.000000e+00 : f32
      %71 = vector.broadcast %cst_34 : f32 to vector<1x1xf32>
      %c0_35 = arith.constant 0 : index
      %c0_36 = arith.constant 0 : index
      %72 = vector.load %arg9[%c0_35, %c0_36] : memref<1x1xf32, #tpu.memory_space<vmem>>, vector<1x1xf32>
      tpu.vector_store %arg9[%c0_35, %c0_36], %71 {strides = array<i32>} : memref<1x1xf32, #tpu.memory_space<vmem>>, vector<1x1xf32>,
    } else {
    }
    %c0_i32_4 = arith.constant 0 : i32
    %9 = arith.cmpi eq, %arg1, %c0_i32_4 : i32
    %10 = arith.extui %9 : i1 to i32
    %c0_i32_5 = arith.constant 0 : i32
    %11 = arith.cmpi ne, %10, %c0_i32_5 : i32
    scf.if %11 {
      %cst_34 = arith.constant 0xFF800000 : f32
      %71 = vector.broadcast %cst_34 : f32 to vector<128x1xf32>
      %c0_35 = arith.constant 0 : index
      %c0_36 = arith.constant 0 : index
      %72 = vector.load %arg5[%c0_35, %c0_36] : memref<128x1xf32, #tpu.memory_space<vmem>>, vector<128x1xf32>
      tpu.vector_store %arg5[%c0_35, %c0_36], %71 {strides = array<i32>} : memref<128x1xf32, #tpu.memory_space<vmem>>, vector<128x1xf32>,
      %cst_37 = arith.constant 0.000000e+00 : f32
      %73 = vector.broadcast %cst_37 : f32 to vector<128x1xf32>
      %c0_38 = arith.constant 0 : index
      %c0_39 = arith.constant 0 : index
      %74 = vector.load %arg6[%c0_38, %c0_39] : memref<128x1xf32, #tpu.memory_space<vmem>>, vector<128x1xf32>
      tpu.vector_store %arg6[%c0_38, %c0_39], %73 {strides = array<i32>} : memref<128x1xf32, #tpu.memory_space<vmem>>, vector<128x1xf32>,
    } else {
    }
    %c0_i32_6 = arith.constant 0 : i32
    %12 = arith.cmpi eq, %arg0, %c0_i32_6 : i32
    %13 = arith.extui %12 : i1 to i32
    %c0_i32_7 = arith.constant 0 : i32
    %14 = arith.cmpi ne, %13, %c0_i32_7 : i32
    scf.if %14 {
      %cst_34 = arith.constant 0xFF800000 : f32
      %71 = vector.broadcast %cst_34 : f32 to vector<1x128xf32>
      %72 = arith.index_cast %arg1 : i32 to index
      %c0_35 = arith.constant 0 : index
      %c0_36 = arith.constant 0 : index
      %73 = vector.load %arg7[%72, %c0_35, %c0_36] : memref<2x1x128xf32, #tpu.memory_space<vmem>>, vector<1x1x128xf32>
      %74 = vector.shape_cast %73 : vector<1x1x128xf32> to vector<1x128xf32>
      %75 = vector.shape_cast %71 : vector<1x128xf32> to vector<1x1x128xf32>
      tpu.vector_store %arg7[%72, %c0_35, %c0_36], %75 {strides = array<i32>} : memref<2x1x128xf32, #tpu.memory_space<vmem>>, vector<1x1x128xf32>,
      %cst_37 = arith.constant 0.000000e+00 : f32
      %76 = vector.broadcast %cst_37 : f32 to vector<1x128xf32>
      %77 = arith.index_cast %arg1 : i32 to index
      %c0_38 = arith.constant 0 : index
      %c0_39 = arith.constant 0 : index
      %78 = vector.load %arg8[%77, %c0_38, %c0_39] : memref<2x1x128xf32, #tpu.memory_space<vmem>>, vector<1x1x128xf32>
      %79 = vector.shape_cast %78 : vector<1x1x128xf32> to vector<1x128xf32>
      %80 = vector.shape_cast %76 : vector<1x128xf32> to vector<1x1x128xf32>
      tpu.vector_store %arg8[%77, %c0_38, %c0_39], %80 {strides = array<i32>} : memref<2x1x128xf32, #tpu.memory_space<vmem>>, vector<1x1x128xf32>,
    } else {
    }
    %c0_8 = arith.constant 0 : index
    %c0_9 = arith.constant 0 : index
    %15 = vector.load %arg5[%c0_8, %c0_9] : memref<128x1xf32, #tpu.memory_space<vmem>>, vector<128x1xf32>
    %cst = arith.constant dense<0xFF800000> : vector<128xf32>
    %16 = vector.multi_reduction <maximumf>, %3, %cst [1] : vector<128x128xf32> to vector<128xf32>
    %17 = vector.shape_cast %16 : vector<128xf32> to vector<128x1xf32>
    %18 = arith.maximumf %15, %17 : vector<128x1xf32>
    %19 = vector.broadcast %18 : vector<128x1xf32> to vector<128x128xf32>
    %20 = arith.subf %3, %19 : vector<128x128xf32>
    %21 = math.exp %20 : vector<128x128xf32>
    %c0_10 = arith.constant 0 : index
    %c0_11 = arith.constant 0 : index
    %22 = vector.load %arg6[%c0_10, %c0_11] : memref<128x1xf32, #tpu.memory_space<vmem>>, vector<128x1xf32>
    %23 = arith.subf %15, %18 : vector<128x1xf32>
    %24 = math.exp %23 : vector<128x1xf32>
    %25 = arith.mulf %22, %24 : vector<128x1xf32>
    %cst_12 = arith.constant dense<0.000000e+00> : vector<128xf32>
    %26 = vector.multi_reduction <add>, %21, %cst_12 [1] : vector<128x128xf32> to vector<128xf32>
    %27 = vector.shape_cast %26 : vector<128xf32> to vector<128x1xf32>
    %28 = arith.addf %25, %27 : vector<128x1xf32>
    %c0_13 = arith.constant 0 : index
    %c0_14 = arith.constant 0 : index
    %29 = vector.load %arg6[%c0_13, %c0_14] : memref<128x1xf32, #tpu.memory_space<vmem>>, vector<128x1xf32>
    tpu.vector_store %arg6[%c0_13, %c0_14], %28 {strides = array<i32>} : memref<128x1xf32, #tpu.memory_space<vmem>>, vector<128x1xf32>,
    %c0_15 = arith.constant 0 : index
    %c0_16 = arith.constant 0 : index
    %30 = vector.load %arg5[%c0_15, %c0_16] : memref<128x1xf32, #tpu.memory_space<vmem>>, vector<128x1xf32>
    tpu.vector_store %arg5[%c0_15, %c0_16], %18 {strides = array<i32>} : memref<128x1xf32, #tpu.memory_space<vmem>>, vector<128x1xf32>,
    %31 = arith.index_cast %arg1 : i32 to index
    %c0_17 = arith.constant 0 : index
    %c0_18 = arith.constant 0 : index
    %32 = vector.load %arg7[%31, %c0_17, %c0_18] : memref<2x1x128xf32, #tpu.memory_space<vmem>>, vector<1x1x128xf32>
    %33 = vector.shape_cast %32 : vector<1x1x128xf32> to vector<1x128xf32>
    %cst_19 = arith.constant dense<0xFF800000> : vector<128xf32>
    %34 = vector.multi_reduction <maximumf>, %3, %cst_19 [0] : vector<128x128xf32> to vector<128xf32>
    %35 = vector.shape_cast %34 : vector<128xf32> to vector<1x128xf32>
    %36 = arith.maximumf %33, %35 : vector<1x128xf32>
    %37 = vector.broadcast %36 : vector<1x128xf32> to vector<128x128xf32>
    %38 = arith.subf %3, %37 : vector<128x128xf32>
    %39 = math.exp %38 : vector<128x128xf32>
    %40 = arith.index_cast %arg1 : i32 to index
    %c0_20 = arith.constant 0 : index
    %c0_21 = arith.constant 0 : index
    %41 = vector.load %arg8[%40, %c0_20, %c0_21] : memref<2x1x128xf32, #tpu.memory_space<vmem>>, vector<1x1x128xf32>
    %42 = vector.shape_cast %41 : vector<1x1x128xf32> to vector<1x128xf32>
    %43 = arith.subf %33, %36 : vector<1x128xf32>
    %44 = math.exp %43 : vector<1x128xf32>
    %45 = arith.mulf %42, %44 : vector<1x128xf32>
    %cst_22 = arith.constant dense<0.000000e+00> : vector<128xf32>
    %46 = vector.multi_reduction <add>, %39, %cst_22 [0] : vector<128x128xf32> to vector<128xf32>
    %47 = vector.shape_cast %46 : vector<128xf32> to vector<1x128xf32>
    %48 = arith.addf %45, %47 : vector<1x128xf32>
    %49 = arith.index_cast %arg1 : i32 to index
    %c0_23 = arith.constant 0 : index
    %c0_24 = arith.constant 0 : index
    %50 = vector.load %arg8[%49, %c0_23, %c0_24] : memref<2x1x128xf32, #tpu.memory_space<vmem>>, vector<1x1x128xf32>
    %51 = vector.shape_cast %50 : vector<1x1x128xf32> to vector<1x128xf32>
    %52 = vector.shape_cast %48 : vector<1x128xf32> to vector<1x1x128xf32>
    tpu.vector_store %arg8[%49, %c0_23, %c0_24], %52 {strides = array<i32>} : memref<2x1x128xf32, #tpu.memory_space<vmem>>, vector<1x1x128xf32>,
    %53 = arith.index_cast %arg1 : i32 to index
    %c0_25 = arith.constant 0 : index
    %c0_26 = arith.constant 0 : index
    %54 = vector.load %arg7[%53, %c0_25, %c0_26] : memref<2x1x128xf32, #tpu.memory_space<vmem>>, vector<1x1x128xf32>
    %55 = vector.shape_cast %54 : vector<1x1x128xf32> to vector<1x128xf32>
    %56 = vector.shape_cast %36 : vector<1x128xf32> to vector<1x1x128xf32>
    tpu.vector_store %arg7[%53, %c0_25, %c0_26], %56 {strides = array<i32>} : memref<2x1x128xf32, #tpu.memory_space<vmem>>, vector<1x1x128xf32>,
    %57 = arith.cmpi eq, %arg0, %arg1 : i32
    %58 = arith.extui %57 : i1 to i32
    %c0_i32_27 = arith.constant 0 : i32
    %59 = arith.cmpi ne, %58, %c0_i32_27 : i32
    scf.if %59 {
      %71 = tpu.iota {dimensions = array<i32: 0>} : vector<128x128xi32>
      %72 = tpu.iota {dimensions = array<i32: 1>} : vector<128x128xi32>
      %73 = arith.cmpi eq, %71, %72 : vector<128x128xi32>
      %cst_34 = arith.constant 0.000000e+00 : f32
      %74 = vector.broadcast %cst_34 : f32 to vector<128x128xf32>
      %75 = arith.select %73, %3, %74 : vector<128x128xi1>, vector<128x128xf32>
      %cst_35 = arith.constant dense<0.000000e+00> : vector<128xf32>
      %76 = vector.multi_reduction <add>, %75, %cst_35 [1] : vector<128x128xf32> to vector<128xf32>
      %77 = vector.shape_cast %76 : vector<128xf32> to vector<128x1xf32>
      %cst_36 = arith.constant dense<0.000000e+00> : vector<1xf32>
      %78 = vector.multi_reduction <add>, %77, %cst_36 [0] : vector<128x1xf32> to vector<1xf32>
      %79 = vector.shape_cast %78 : vector<1xf32> to vector<1x1xf32>
      %c0_37 = arith.constant 0 : index
      %c0_38 = arith.constant 0 : index
      %80 = vector.load %arg9[%c0_37, %c0_38] : memref<1x1xf32, #tpu.memory_space<vmem>>, vector<1x1xf32>
      %cst_39 = arith.constant 2.000000e+00 : f32
      %81 = vector.broadcast %cst_39 : f32 to vector<1x1xf32>
      %82 = arith.mulf %81, %79 : vector<1x1xf32>
      %83 = arith.subf %80, %82 : vector<1x1xf32>
      %c0_40 = arith.constant 0 : index
      %c0_41 = arith.constant 0 : index
      %84 = vector.load %arg9[%c0_40, %c0_41] : memref<1x1xf32, #tpu.memory_space<vmem>>, vector<1x1xf32>
      tpu.vector_store %arg9[%c0_40, %c0_41], %83 {strides = array<i32>} : memref<1x1xf32, #tpu.memory_space<vmem>>, vector<1x1xf32>,
    } else {
    }
    %c1_i32 = arith.constant 1 : i32
    %60 = arith.cmpi eq, %arg1, %c1_i32 : i32
    %61 = arith.extui %60 : i1 to i32
    %c0_i32_28 = arith.constant 0 : i32
    %62 = arith.cmpi ne, %61, %c0_i32_28 : i32
    scf.if %62 {
      %c0_34 = arith.constant 0 : index
      %c0_35 = arith.constant 0 : index
      %71 = vector.load %arg6[%c0_34, %c0_35] : memref<128x1xf32, #tpu.memory_space<vmem>>, vector<128x1xf32>
      %72 = math.log %71 : vector<128x1xf32>
      %c0_36 = arith.constant 0 : index
      %c0_37 = arith.constant 0 : index
      %73 = vector.load %arg5[%c0_36, %c0_37] : memref<128x1xf32, #tpu.memory_space<vmem>>, vector<128x1xf32>
      %74 = arith.addf %72, %73 : vector<128x1xf32>
      %c0_38 = arith.constant 0 : index
      %c0_39 = arith.constant 0 : index
      %75 = vector.load %arg9[%c0_38, %c0_39] : memref<1x1xf32, #tpu.memory_space<vmem>>, vector<1x1xf32>
      %cst_40 = arith.constant dense<0.000000e+00> : vector<1xf32>
      %76 = vector.multi_reduction <add>, %74, %cst_40 [0] : vector<128x1xf32> to vector<1xf32>
      %77 = vector.shape_cast %76 : vector<1xf32> to vector<1x1xf32>
      %78 = arith.addf %75, %77 : vector<1x1xf32>
      %c0_41 = arith.constant 0 : index
      %c0_42 = arith.constant 0 : index
      %79 = vector.load %arg9[%c0_41, %c0_42] : memref<1x1xf32, #tpu.memory_space<vmem>>, vector<1x1xf32>
      tpu.vector_store %arg9[%c0_41, %c0_42], %78 {strides = array<i32>} : memref<1x1xf32, #tpu.memory_space<vmem>>, vector<1x1xf32>,
    } else {
    }
    %c1_i32_29 = arith.constant 1 : i32
    %63 = arith.cmpi eq, %arg0, %c1_i32_29 : i32
    %64 = arith.extui %63 : i1 to i32
    %c0_i32_30 = arith.constant 0 : i32
    %65 = arith.cmpi ne, %64, %c0_i32_30 : i32
    scf.if %65 {
      %71 = arith.index_cast %arg1 : i32 to index
      %c0_34 = arith.constant 0 : index
      %c0_35 = arith.constant 0 : index
      %72 = vector.load %arg8[%71, %c0_34, %c0_35] : memref<2x1x128xf32, #tpu.memory_space<vmem>>, vector<1x1x128xf32>
      %73 = vector.shape_cast %72 : vector<1x1x128xf32> to vector<1x128xf32>
      %74 = math.log %73 : vector<1x128xf32>
      %75 = arith.index_cast %arg1 : i32 to index
      %c0_36 = arith.constant 0 : index
      %c0_37 = arith.constant 0 : index
      %76 = vector.load %arg7[%75, %c0_36, %c0_37] : memref<2x1x128xf32, #tpu.memory_space<vmem>>, vector<1x1x128xf32>
      %77 = vector.shape_cast %76 : vector<1x1x128xf32> to vector<1x128xf32>
      %78 = arith.addf %74, %77 : vector<1x128xf32>
      %c0_38 = arith.constant 0 : index
      %c0_39 = arith.constant 0 : index
      %79 = vector.load %arg9[%c0_38, %c0_39] : memref<1x1xf32, #tpu.memory_space<vmem>>, vector<1x1xf32>
      %cst_40 = arith.constant dense<0.000000e+00> : vector<1xf32>
      %80 = vector.multi_reduction <add>, %78, %cst_40 [1] : vector<1x128xf32> to vector<1xf32>
      %81 = vector.shape_cast %80 : vector<1xf32> to vector<1x1xf32>
      %82 = arith.addf %79, %81 : vector<1x1xf32>
      %c0_41 = arith.constant 0 : index
      %c0_42 = arith.constant 0 : index
      %83 = vector.load %arg9[%c0_41, %c0_42] : memref<1x1xf32, #tpu.memory_space<vmem>>, vector<1x1xf32>
      tpu.vector_store %arg9[%c0_41, %c0_42], %82 {strides = array<i32>} : memref<1x1xf32, #tpu.memory_space<vmem>>, vector<1x1xf32>,
    } else {
    }
    %c1_i32_31 = arith.constant 1 : i32
    %66 = arith.cmpi eq, %arg0, %c1_i32_31 : i32
    %c1_i32_32 = arith.constant 1 : i32
    %67 = arith.cmpi eq, %arg1, %c1_i32_32 : i32
    %68 = arith.andi %66, %67 : i1
    %69 = arith.extui %68 : i1 to i32
    %c0_i32_33 = arith.constant 0 : i32
    %70 = arith.cmpi ne, %69, %c0_i32_33 : i32
    scf.if %70 {
      %c0_34 = arith.constant 0 : index
      %c0_35 = arith.constant 0 : index
      %71 = vector.load %arg9[%c0_34, %c0_35] : memref<1x1xf32, #tpu.memory_space<vmem>>, vector<1x1xf32>
      %cst_36 = arith.constant 3.906250e-03 : f32
      %72 = vector.broadcast %cst_36 : f32 to vector<1x1xf32>
      %73 = arith.mulf %71, %72 : vector<1x1xf32>
      %c0_37 = arith.constant 0 : index
      %c0_38 = arith.constant 0 : index
      %74 = vector.load %arg4[%c0_37, %c0_38] : memref<1x1xf32, #tpu.memory_space<vmem>>, vector<1x1xf32>
      tpu.vector_store %arg4[%c0_37, %c0_38], %73 {strides = array<i32>} : memref<1x1xf32, #tpu.memory_space<vmem>>, vector<1x1xf32>,
    } else {
    }
    return
  }
  func.func @transform_0(%arg0: i32, %arg1: i32) -> i32 {
    %c0_i32 = arith.constant 0 : i32
    %c0_i32_0 = arith.constant 0 : i32
    return %c0_i32 : i32
  }
  func.func @transform_1(%arg0: i32, %arg1: i32) -> (i32, i32) {
    %c0_i32 = arith.constant 0 : i32
    return %arg0, %arg1 : i32, i32
  }
  func.func @transform_2(%arg0: i32, %arg1: i32) -> (i32, i32) {
    %c0_i32 = arith.constant 0 : i32
    %c0_i32_0 = arith.constant 0 : i32
    %c0_i32_1 = arith.constant 0 : i32
    return %c0_i32, %c0_i32_0 : i32, i32
  }
}

</mosaic_0001>

<bundles_post_ra>
// kernel: tpu_custom_call.1
= control target key start
LH: loop header
LB: loop body
LE: loop exit
PB: predicated region body
PF: predicated region fallthrough
CT: control target
= control target key end

     0   :  { %s2048_s0 = inlined_call_operand.<no memory space> [shape: f32[1], index: 0, kind: input, shape index: {}]   ;;  %s2049_s1 = inlined_call_operand.hbm [shape: f32[256,256], index: 1, kind: input, shape index: {}]   ;;  %s2050_s2 = inlined_call_operand.hbm [shape: f32[1,1], index: 2, kind: output, shape index: {}]  }
   0x1   :  { %7 = sst [smem:[#allocation7]] %s2048_s0 }
   0x2   :  { %8 = vsyncpa [#allocation9], 0 }
   0x3   :  { %10 = vsyncpa [#allocation9 + $0x1], 0 }
   0x4   :  { %11 = vsyncpa [#allocation10], 0  ;;  %s1452_s11 = smov 0   ;;  %s1454_s12 = smov 0  }
   0x5   :  { %s1456_s13 = smov 0   ;;  %s1458_s14 = smov 0  }
   0x6   :  { %s1460_s15 = smov 0   ;;  %s1462_s16 = smov 0  }
   0x7   :  { %s1464_s17 = smov 0   ;;  %s1466_s18 = smov 0  }
   0x8 LB: > { %s1053_s0 = sadd.s32 4294967295, %s1422_s18   ;;  %s26_s19 = sadd.s32 1, %s1414_s16  ;;  %s1422_s18 = sphi %s1466_s18, %s17_s18   ;;  %s1418_s17 = sphi %s1464_s17, %s2094_s17   ;;  %s1414_s16 = sphi %s1462_s16, %s2093_s16   ;;  %s1410_s15 = sphi %s1460_s15, %s2092_s15   ;;  %s1406_s14 = sphi %s1458_s14, %s2091_s14   ;;  %s1402_s13 = sphi %s1456_s13, %s2090_s13   ;;  %s1398_s12 = sphi %s1454_s12, %s2089_s12   ;;  %s1394_s11 = sphi %s1452_s11, %s2088_s11  }
   0x9   : > { %p27_p0 = scmp.ge.s32.totalorder %s26_s19, 2  ;;  %s29_s20 = sadd.s32 1, %s1418_s17 }
   0xa   : > { %s59_s21 = sadd.s32 1, %s1402_s13  ;;  %p66_p1 = scmp.ne.s32.totalorder %s1402_s13, %s1398_s12 }
   0xb   : > { %s2096_s19 = smov (%p27_p0, %s26_s19), 0  ;;  %s2098_s20 = smov (!%p27_p0, %s29_s20), %s1418_s17 }
   0xc   : > { %s55_s22 = ssub.s32 %s1414_s16, %s2096_s19  ;;  %p67_p2 = scmp.eq.s32.totalorder %s1422_s18, 0 }
   0xd   : > { %p31_p3 = scmp.ge.s32.totalorder %s2098_s20, 2  ;;  %p72_p4 = scmp.ne.s32.totalorder %s1398_s12, %s1394_s11 }
   0xe   : > { %p1503_p5 = por %p67_p2, %p66_p1  ;;  %p73_p6 = scmp.eq.s32.totalorder %s1053_s0, 0 }
   0xf   : > { %s2100_s20 = smov (%p31_p3, %s2098_s20), 0  ;;  %p1082_p8 = scmp.lt.s32.totalorder %s1422_s18, 4 }
  0x10   : > { %p1511_p7 = por %p73_p6, %p72_p4  ;;  %s54_s25 = ssub.s32 %s1418_s17, %s2100_s20 }
  0x11   : > { %s56_s26 = sor.u32 %s55_s22, %s54_s25  ;;  %s120_s27 = sand.u32 1, %s1402_s13  }
  0x12   : > { %p57_p9 = scmp.eq.s32.totalorder %s56_s26, 0  ;;  %s1056_s28 = sshll.u32 %s120_s27, 7 }
  0x13   : > { %s1071_s29 = sshll.u32 %s1418_s17, 5  ;;  %s124_s5 = scalar_lea.vmem [#allocation8], %s1056_s28 }
  0x14   : > { %s1521_s30 = scalar_select %p57_p9, %s1402_s13, %s59_s21  }
  0x15   : > { %s129_s3 = sadd.s32 %s1414_s16, %s1071_s29  ;;  %s134_s6 = sshll.u32 %s124_s5, 4  ;;  %s135_s6 = int_to_ptr.vmem [resolvable:$true] %s134_s6 }
  0x16   : > { %s1059_s4 = sshll.u32 %s129_s3, 3  ;;  %p1079_p10 = pnand %p1082_p8, %p1503_p5 }
  0x17   : > { %s131_s9 = scalar_lea.hbm %s2049_s1, %s1059_s4  ;;  %p1060_p11 = scmp.ge.s32.totalorder %s1422_s18, 1 }
  0x18   : > { %s132_s10 = sshll.u32 %s131_s9, 4  ;;  %s121_s11 = scalar_lea.sflag [#allocation9], %s120_s27  ;;  %s133_s10 = int_to_ptr.hbm [resolvable:$true] %s132_s10 }
  0x19   : > { %s1424_s22 = smov 256   ;;  %s1425_s21 = smov 128  }
  0x1a   : > { %s1426_s25 = smov 8   ;;  %p142_p12 = scmp.lt.s32.totalorder %s1422_s18, 5 }
  0x1b   : > { %1081 = dma.hbm_to_vmem [thread:$0]  (!%p1079_p10), %s133_s10, 2048, %s135_s6, %s121_s11, %s1424_s22, %s1425_s21, %s1426_s25  }
  0x1c   : > { %p143_p13 = pnand %p1060_p11, %p142_p12 }
  0x1e   : > { %146 = sbr.rel (%p143_p13) target bundleno = 914 (0x392), region = 28 }
  0x23   : > { %s148_s26 = sand.u32 1, %s1398_s12  }
  0x24   : > { %s1061_s28 = sshll.u32 %s148_s26, 7  ;;  %s149_s29 = scalar_lea.sflag [#allocation9], %s148_s26 }
  0x25   : > { %s1534_s3 = scalar_lea.vmem [#allocation8], %s1061_s28 }
  0x26   : > { %1385 = dma.done.wait (%p1511_p7), %s149_s29, 2048  }
  0x27   : > { %1387 = vsyncadd (%p1511_p7), %s149_s29, 4294965248  ;;  %p204_p0 = scmp.eq.s32.totalorder %s1410_s15, 0  ;;  %p205_p1 = scmp.eq.s32.totalorder %s1406_s14, 0  ;;  %v171_v0 = vld [vmem:[%s1534_s3] sm:$0xff]  ;;  %v172_v1 = vld [vmem:[%s1534_s3 + $0x8] sm:$0xff] }
  0x28   : > { %s170_s23 = sld [smem:[#allocation7]]  ;;  %v173_v2 = vld [vmem:[%s1534_s3 + $0x10] sm:$0xff]  ;;  %v174_v4 = vld [vmem:[%s1534_s3 + $0x18] sm:$0xff]  ;;  %v175_v5 = vld [vmem:[%s1534_s3 + $0x20] sm:$0xff] }
  0x29   : > { %p1542_p2 = pnand %p205_p1, %p204_p0  ;;  %v176_v6 = vld [vmem:[%s1534_s3 + $0x28] sm:$0xff]  ;;  %v177_v10 = vld [vmem:[%s1534_s3 + $0x30] sm:$0xff]  ;;  %v178_v11 = vld [vmem:[%s1534_s3 + $0x38] sm:$0xff] }
  0x2a   : > { %v179_v12 = vld [vmem:[%s1534_s3 + $0x40] sm:$0xff]  ;;  %v180_v16 = vld [vmem:[%s1534_s3 + $0x48] sm:$0xff]  ;;  %v181_v17 = vld [vmem:[%s1534_s3 + $0x50] sm:$0xff] }
  0x2b   : > { %v182_v18 = vld [vmem:[%s1534_s3 + $0x58] sm:$0xff]  ;;  %v183_v22 = vld [vmem:[%s1534_s3 + $0x60] sm:$0xff]  ;;  %v184_v23 = vld [vmem:[%s1534_s3 + $0x68] sm:$0xff] }
  0x2c   : > { %v185_v24 = vld [vmem:[%s1534_s3 + $0x70] sm:$0xff]  ;;  %v186_v28 = vld [vmem:[%s1534_s3 + $0x78] sm:$0xff] }
  0x2e   : > { %v187_v3 = vstv %s170_s23 }
  0x2f   : > { %v1552_v7 = vmul.f32 %v187_v3, %v171_v0  ;;  %v1554_v8 = vmul.f32 %v187_v3, %v172_v1  ;;  %v1556_v9 = vmul.f32 %v187_v3, %v173_v2  ;;  %v1561_v13 = vmul.f32 %v187_v3, %v174_v4 }
  0x30   : > { %v1563_v14 = vmul.f32 %v187_v3, %v175_v5  ;;  %v1565_v15 = vmul.f32 %v187_v3, %v176_v6  ;;  %v1570_v19 = vmul.f32 %v187_v3, %v177_v10  ;;  %v1572_v20 = vmul.f32 %v187_v3, %v178_v11 }
  0x31   : > { %v1574_v21 = vmul.f32 %v187_v3, %v179_v12  ;;  %v1579_v25 = vmul.f32 %v187_v3, %v180_v16  ;;  %v1581_v26 = vmul.f32 %v187_v3, %v181_v17  ;;  %v1583_v27 = vmul.f32 %v187_v3, %v182_v18  ;;  %209 = sbr.rel (%p1542_p2) target bundleno = 56 (0x38), region = 36 }
  0x32   : > { %v1586_v29 = vmul.f32 %v187_v3, %v183_v22  ;;  %v1588_v30 = vmul.f32 %v187_v3, %v184_v23  ;;  %v1590_v31 = vmul.f32 %v187_v3, %v185_v24  ;;  %v1592_v32 = vmul.f32 %v187_v3, %v186_v28 }
  0x33   : > { %2060 = vst [vmem:[#allocation14_spill] sm:$0xff] %v1574_v21 }
  0x34   : > { %2061 = vst [vmem:[#allocation15_spill] sm:$0xff] %v1581_v26 }
  0x35   : > { %2062 = vst [vmem:[#allocation16_spill] sm:$0xff] %v1583_v27 }
  0x36   : > { %vm210_vm0 = vcmask 0   ;;  %v1427_v33 = vmov 0.0  }
  0x37   : > { %211 = vst.msk [vmem:[#allocation6] sm:$0x1] %vm210_vm0, %v1427_v33 }
  0x38 PF: > { %p1062_p3 = scmp.ne.s32.totalorder %s1406_s14, 0 }
  0x3a   : > { %214 = sbr.rel (%p1062_p3) target bundleno = 96 (0x60), region = 40 }
  0x3f   : > { %vm215_vm1 = vcmask 7168   ;;  %v1428_v34 = vmov -inf   ;;  %v1429_v35 = vmov 0.0  }
  0x40   : > { %216 = vst.msk [vmem:[#allocation2] sm:$0xff] %vm215_vm1, %v1428_v34 }
  0x41   : > { %217 = vst.msk [vmem:[#allocation2 + $0x8] sm:$0xff] %vm215_vm1, %v1428_v34 }
  0x42   : > { %218 = vst.msk [vmem:[#allocation2 + $0x10] sm:$0xff] %vm215_vm1, %v1428_v34 }
  0x43   : > { %219 = vst.msk [vmem:[#allocation2 + $0x18] sm:$0xff] %vm215_vm1, %v1428_v34 }
  0x44   : > { %220 = vst.msk [vmem:[#allocation2 + $0x20] sm:$0xff] %vm215_vm1, %v1428_v34 }
  0x45   : > { %221 = vst.msk [vmem:[#allocation2 + $0x28] sm:$0xff] %vm215_vm1, %v1428_v34 }
  0x46   : > { %222 = vst.msk [vmem:[#allocation2 + $0x30] sm:$0xff] %vm215_vm1, %v1428_v34 }
  0x47   : > { %223 = vst.msk [vmem:[#allocation2 + $0x38] sm:$0xff] %vm215_vm1, %v1428_v34 }
  0x48   : > { %224 = vst.msk [vmem:[#allocation2 + $0x40] sm:$0xff] %vm215_vm1, %v1428_v34 }
  0x49   : > { %225 = vst.msk [vmem:[#allocation2 + $0x48] sm:$0xff] %vm215_vm1, %v1428_v34 }
  0x4a   : > { %226 = vst.msk [vmem:[#allocation2 + $0x50] sm:$0xff] %vm215_vm1, %v1428_v34 }
  0x4b   : > { %227 = vst.msk [vmem:[#allocation2 + $0x58] sm:$0xff] %vm215_vm1, %v1428_v34 }
  0x4c   : > { %228 = vst.msk [vmem:[#allocation2 + $0x60] sm:$0xff] %vm215_vm1, %v1428_v34 }
  0x4d   : > { %229 = vst.msk [vmem:[#allocation2 + $0x68] sm:$0xff] %vm215_vm1, %v1428_v34 }
  0x4e   : > { %230 = vst.msk [vmem:[#allocation2 + $0x70] sm:$0xff] %vm215_vm1, %v1428_v34 }
  0x4f   : > { %231 = vst.msk [vmem:[#allocation2 + $0x78] sm:$0xff] %vm215_vm1, %v1428_v34 }
  0x50   : > { %232 = vst.msk [vmem:[#allocation3] sm:$0xff] %vm215_vm1, %v1429_v35 }
  0x51   : > { %233 = vst.msk [vmem:[#allocation3 + $0x8] sm:$0xff] %vm215_vm1, %v1429_v35 }
  0x52   : > { %234 = vst.msk [vmem:[#allocation3 + $0x10] sm:$0xff] %vm215_vm1, %v1429_v35 }
  0x53   : > { %235 = vst.msk [vmem:[#allocation3 + $0x18] sm:$0xff] %vm215_vm1, %v1429_v35 }
  0x54   : > { %236 = vst.msk [vmem:[#allocation3 + $0x20] sm:$0xff] %vm215_vm1, %v1429_v35 }
  0x55   : > { %237 = vst.msk [vmem:[#allocation3 + $0x28] sm:$0xff] %vm215_vm1, %v1429_v35 }
  0x56   : > { %238 = vst.msk [vmem:[#allocation3 + $0x30] sm:$0xff] %vm215_vm1, %v1429_v35 }
  0x57   : > { %239 = vst.msk [vmem:[#allocation3 + $0x38] sm:$0xff] %vm215_vm1, %v1429_v35 }
  0x58   : > { %240 = vst.msk [vmem:[#allocation3 + $0x40] sm:$0xff] %vm215_vm1, %v1429_v35 }
  0x59   : > { %241 = vst.msk [vmem:[#allocation3 + $0x48] sm:$0xff] %vm215_vm1, %v1429_v35 }
  0x5a   : > { %242 = vst.msk [vmem:[#allocation3 + $0x50] sm:$0xff] %vm215_vm1, %v1429_v35 }
  0x5b   : > { %243 = vst.msk [vmem:[#allocation3 + $0x58] sm:$0xff] %vm215_vm1, %v1429_v35 }
  0x5c   : > { %244 = vst.msk [vmem:[#allocation3 + $0x60] sm:$0xff] %vm215_vm1, %v1429_v35 }
  0x5d   : > { %245 = vst.msk [vmem:[#allocation3 + $0x68] sm:$0xff] %vm215_vm1, %v1429_v35 }
  0x5e   : > { %246 = vst.msk [vmem:[#allocation3 + $0x70] sm:$0xff] %vm215_vm1, %v1429_v35 }
  0x5f   : > { %247 = vst.msk [vmem:[#allocation3 + $0x78] sm:$0xff] %vm215_vm1, %v1429_v35 }
  0x60 PF: > { %p1063_p4 = scmp.ne.s32.totalorder %s1410_s15, 0 }
  0x61   : > { %s251_s24 = scalar_lea.vmem (!%p1063_p4), [#allocation4], %s1406_s14  ;;  %s253_s4 = scalar_lea.vmem (!%p1063_p4), [#allocation5], %s1406_s14 }
  0x62   : > { %250 = sbr.rel (%p1063_p4) target bundleno = 106 (0x6a), region = 44 }
  0x67   : > { %v1430_v36 = vmov -inf   ;;  %v1431_v37 = vmov 0.0  }
  0x68   : > { %252 = vst [vmem:[%s251_s24] sm:$0x1] %v1430_v36 }
  0x69   : > { %254 = vst [vmem:[%s253_s4] sm:$0x1] %v1431_v37 }
  0x6a PF: > { %275 = vmax.xlane.f32.xlu1 %v1556_v9  ;;  %271 = vmax.xlane.f32.xlu0 %v1552_v7  ;;  %v1432_v38 = vmov 0   ;;  %v1648_v39 = vld [vmem:[#allocation2 + $0x10] sm:$0xff]  ;;  %v1650_v40 = vld [vmem:[#allocation2] sm:$0xff]  ;;  %vm575_vm2 = vcmask 7168   ;;  %v1677_v51 = vld [vmem:[#allocation2 + $0x8] sm:$0xff]  ;;  %s1841_s5 = scalar_lea.vmem [#allocation4], %s1406_s14  ;;  %p1064_p5 = scmp.ne.s32.totalorder %s1410_s15, %s1406_s14 }
  0x6b   : > { %279 = vmax.xlane.f32.xlu2 %v1563_v14  ;;  %1161 = vset.pattern.permute.xlu0 %v1432_v38  ;;  %v1652_v41 = vld [vmem:[#allocation2 + $0x20] sm:$0xff]  ;;  %v1679_v52 = vld [vmem:[#allocation2 + $0x18] sm:$0xff]  ;;  %v1681_v53 = vld [vmem:[#allocation2 + $0x28] sm:$0xff]  ;;  %s1916_s6 = scalar_lea.vmem [#allocation5], %s1406_s14 }
  0x6c   : > { %1159 = vset.pattern.permute.xlu1 %v1432_v38  ;;  %1160 = vset.pattern.permute.xlu2 %v1432_v38  ;;  %v1706_v63 = vld [vmem:[#allocation2 + $0x30] sm:$0xff]  ;;  %v1708_v0 = vld [vmem:[#allocation2 + $0x38] sm:$0xff]  ;;  %v1710_v1 = vld [vmem:[#allocation2 + $0x40] sm:$0xff] }
  0x6d   : > { %v1735_v17 = vld [vmem:[#allocation2 + $0x48] sm:$0xff]  ;;  %v1737_v18 = vld [vmem:[#allocation2 + $0x50] sm:$0xff]  ;;  %v1739_v22 = vld [vmem:[#allocation2 + $0x58] sm:$0xff] }
  0x72   : > { %273 = vmax.xlane.f32.xlu0 %v1554_v8  ;;  %277 = vmax.xlane.f32.xlu1 %v1561_v13 }
  0x73   : > { %281 = vmax.xlane.f32.xlu2 %v1565_v15 }
  0x7a   : > { %283 = vmax.xlane.f32.xlu0 %v1570_v19  ;;  %285 = vmax.xlane.f32.xlu1 %v1572_v20 }
  0x7b   : > { %287 = vmax.xlane.f32.xlu2 %v1574_v21 }
  0x82   : > { %289 = vmax.xlane.f32.xlu0 %v1579_v25  ;;  %291 = vmax.xlane.f32.xlu1 %v1581_v26 }
  0x83   : > { %293 = vmax.xlane.f32.xlu2 %v1583_v27 }
  0x8a   : > { %295 = vmax.xlane.f32.xlu0 %v1586_v29  ;;  %297 = vmax.xlane.f32.xlu1 %v1588_v30 }
  0x8b   : > { %299 = vmax.xlane.f32.xlu2 %v1590_v31 }
  0x92   : > { %301 = vmax.xlane.f32.xlu0 %v1592_v32 }
  0xdd   : > { %v276_v42 = vpop.xlane.xlu1 %275  ;;  %v272_v43 = vpop.xlane.xlu0 %271 }
  0xde   : > { %v1655_v44 = vmax.f32 %v1648_v39, %v276_v42  ;;  %v1658_v45 = vmax.f32 %v1650_v40, %v272_v43  ;;  %v280_v46 = vpop.xlane.xlu2 %279  ;;  %v1765_v42 = vld [vmem:[#allocation2 + $0x60] sm:$0xff]  ;;  %v1767_v43 = vld [vmem:[#allocation2 + $0x68] sm:$0xff] }
  0xdf   : > { %v1661_v47 = vmax.f32 %v1652_v41, %v280_v46  ;;  %v1769_v46 = vld [vmem:[#allocation2 + $0x70] sm:$0xff] }
  0xe0   : > { %594 = vst.msk [vmem:[#allocation2 + $0x10] sm:$0xff] %vm575_vm2, %v1655_v44  ;;  %331 = vperm.xlu0 %1161, %v1655_v44   ;;  %321 = vperm.xlu1 %1159, %v1658_v45  }
  0xe1   : > { %592 = vst.msk [vmem:[#allocation2] sm:$0xff] %vm575_vm2, %v1658_v45 }
  0xe2   : > { %596 = vst.msk [vmem:[#allocation2 + $0x20] sm:$0xff] %vm575_vm2, %v1661_v47 }
  0xe3   : > { %2063 = vst [vmem:[#allocation17_spill] sm:$0xff] %v1769_v46 }
  0xe5   : > { %v274_v54 = vpop.xlane.xlu0 %273  ;;  %v278_v55 = vpop.xlane.xlu1 %277 }
  0xe6   : > { %v1684_v56 = vmax.f32 %v1677_v51, %v274_v54  ;;  %v282_v57 = vpop.xlane.xlu2 %281  ;;  %v1687_v58 = vmax.f32 %v1679_v52, %v278_v55 }
  0xe7   : > { %v1690_v59 = vmax.f32 %v1681_v53, %v282_v57 }
  0xe8   : > { %593 = vst.msk [vmem:[#allocation2 + $0x8] sm:$0xff] %vm575_vm2, %v1684_v56  ;;  %326 = vperm.xlu2 %1160, %v1684_v56   ;;  %341 = vperm.xlu1 %1159, %v1661_v47  }
  0xe9   : > { %597 = vst.msk [vmem:[#allocation2 + $0x28] sm:$0xff] %vm575_vm2, %v1690_v59 }
  0xea   : > { %595 = vst.msk [vmem:[#allocation2 + $0x18] sm:$0xff] %vm575_vm2, %v1687_v58 }
  0xed   : > { %v284_v2 = vpop.xlane.xlu0 %283  ;;  %v286_v3 = vpop.xlane.xlu1 %285 }
  0xee   : > { %v1713_v4 = vmax.f32 %v1706_v63, %v284_v2  ;;  %v288_v5 = vpop.xlane.xlu2 %287  ;;  %v1716_v6 = vmax.f32 %v1708_v0, %v286_v3 }
  0xef   : > { %v1719_v10 = vmax.f32 %v1710_v1, %v288_v5 }
  0xf0   : > { %598 = vst.msk [vmem:[#allocation2 + $0x30] sm:$0xff] %vm575_vm2, %v1713_v4  ;;  %336 = vperm.xlu2 %1160, %v1687_v58   ;;  %351 = vperm.xlu1 %1159, %v1713_v4  }
  0xf1   : > { %600 = vst.msk [vmem:[#allocation2 + $0x40] sm:$0xff] %vm575_vm2, %v1719_v10 }
  0xf2   : > { %599 = vst.msk [vmem:[#allocation2 + $0x38] sm:$0xff] %vm575_vm2, %v1716_v6 }
  0xf5   : > { %v290_v23 = vpop.xlane.xlu0 %289  ;;  %v292_v24 = vpop.xlane.xlu1 %291 }
  0xf6   : > { %v1742_v28 = vmax.f32 %v1735_v17, %v290_v23  ;;  %v294_v33 = vpop.xlane.xlu2 %293  ;;  %v1745_v34 = vmax.f32 %v1737_v18, %v292_v24 }
  0xf7   : > { %v1748_v35 = vmax.f32 %v1739_v22, %v294_v33 }
  0xf8   : > { %601 = vst.msk [vmem:[#allocation2 + $0x48] sm:$0xff] %vm575_vm2, %v1742_v28  ;;  %366 = vperm.xlu0 %1161, %v1742_v28   ;;  %346 = vperm.xlu2 %1160, %v1690_v59  }
  0xf9   : > { %361 = vperm.xlu1 %1159, %v1719_v10   ;;  %603 = vst.msk [vmem:[#allocation2 + $0x58] sm:$0xff] %vm575_vm2, %v1748_v35 }
  0xfa   : > { %602 = vst.msk [vmem:[#allocation2 + $0x50] sm:$0xff] %vm575_vm2, %v1745_v34 }
  0xfd   : > { %v296_v54 = vpop.xlane.xlu0 %295  ;;  %v298_v55 = vpop.xlane.xlu1 %297 }
  0xfe   : > { %v1772_v57 = vmax.f32 %v1765_v42, %v296_v54  ;;  %v300_v2 = vpop.xlane.xlu2 %299  ;;  %v1775_v3 = vmax.f32 %v1767_v43, %v298_v55  ;;  %v1795_v54 = vld [vmem:[#allocation2 + $0x78] sm:$0xff] }
  0xff   : > { %v1778_v5 = vmax.f32 %v1769_v46, %v300_v2 }
 0x100   : > { %604 = vst.msk [vmem:[#allocation2 + $0x60] sm:$0xff] %vm575_vm2, %v1772_v57  ;;  %381 = vperm.xlu0 %1161, %v1772_v57   ;;  %356 = vperm.xlu2 %1160, %v1716_v6  }
 0x101   : > { %2064 = vst [vmem:[#allocation18_spill] sm:$0xff] %v1778_v5  ;;  %376 = vperm.xlu1 %1159, %v1748_v35  }
 0x102   : > { %606 = vst.msk [vmem:[#allocation2 + $0x70] sm:$0xff] %vm575_vm2, %v1778_v5 }
 0x103   : > { %605 = vst.msk [vmem:[#allocation2 + $0x68] sm:$0xff] %vm575_vm2, %v1775_v3 }
 0x105   : > { %v302_v55 = vpop.xlane.xlu0 %301 }
 0x106   : > { %v1798_v2 = vmax.f32 %v1795_v54, %v302_v55 }
 0x108   : > { %2065 = vst [vmem:[#allocation19_spill] sm:$0xff] %v1798_v2  ;;  %396 = vperm.xlu0 %1161, %v1798_v2   ;;  %371 = vperm.xlu2 %1160, %v1745_v34  }
 0x109   : > { %607 = vst.msk [vmem:[#allocation2 + $0x78] sm:$0xff] %vm575_vm2, %v1798_v2  ;;  %391 = vperm.xlu1 %1159, %v1778_v5  }
 0x110   : > { %386 = vperm.xlu2 %1160, %v1775_v3  }
 0x142   : > { %v327_v33 = vpop.permute.xlu2 %326 }
 0x143   : > { %v400_v24 = vsub.f32 %v1554_v8, %v327_v33 }
 0x145   : > { %v417_v23 = vmul.f32 1.442695, %v400_v24 }
 0x147   : > { %1162 = vpow2.f32 %v417_v23 }
 0x14a   : > { %v337_v55 = vpop.permute.xlu2 %336 }
 0x14b   : > { %v402_v50 = vsub.f32 %v1561_v13, %v337_v55 }
 0x14d   : > { %v1163_v16 = vpop.eup %1162  ;;  %v421_v48 = vmul.f32 1.442695, %v402_v50 }
 0x14e   : > { %529 = vadd.xlane.f32.xlu1 %v1163_v16 }
 0x152   : > { %v332_v38 = vpop.permute.xlu0 %331  ;;  %v347_v37 = vpop.permute.xlu2 %346 }
 0x153   : > { %v401_v36 = vsub.f32 %v1556_v9, %v332_v38  ;;  %v322_v62 = vpop.permute.xlu1 %321 }
 0x154   : > { %v399_v12 = vsub.f32 %v1552_v7, %v322_v62  ;;  %v404_v62 = vsub.f32 %v1565_v15, %v347_v37 }
 0x155   : > { %v419_v11 = vmul.f32 1.442695, %v401_v36 }
 0x156   : > { %v415_v61 = vmul.f32 1.442695, %v399_v12  ;;  %v425_v55 = vmul.f32 1.442695, %v404_v62 }
 0x157   : > { %1164 = vpow2.f32 %v419_v11 }
 0x158   : > { %1166 = vpow2.f32 %v415_v61 }
 0x15a   : > { %v357_v49 = vpop.permute.xlu2 %356 }
 0x15b   : > { %v342_v33 = vpop.permute.xlu1 %341  ;;  %v406_v38 = vsub.f32 %v1572_v20, %v357_v49 }
 0x15c   : > { %v403_v23 = vsub.f32 %v1563_v14, %v342_v33 }
 0x15d   : > { %v1165_v24 = vpop.eup %1164  ;;  %v429_v12 = vmul.f32 1.442695, %v406_v38 }
 0x15e   : > { %v423_v16 = vmul.f32 1.442695, %v403_v23  ;;  %531 = vadd.xlane.f32.xlu0 %v1165_v24  ;;  %v1167_v60 = vpop.eup %1166 }
 0x15f   : > { %527 = vadd.xlane.f32.xlu2 %v1167_v60 }
 0x160   : > { %1168 = vpow2.f32 %v423_v16 }
 0x161   : > { %1170 = vpow2.f32 %v421_v48 }
 0x162   : > { %v372_v11 = vpop.permute.xlu2 %371  ;;  %1172 = vpow2.f32 %v429_v12 }
 0x163   : > { %v352_v36 = vpop.permute.xlu1 %351  ;;  %v409_v50 = vsub.f32 %v1581_v26, %v372_v11 }
 0x164   : > { %v405_v61 = vsub.f32 %v1570_v19, %v352_v36 }
 0x165   : > { %v435_v23 = vmul.f32 1.442695, %v409_v50 }
 0x166   : > { %v1169_v5 = vpop.eup %1168  ;;  %v427_v33 = vmul.f32 1.442695, %v405_v61 }
 0x167   : > { %v1171_v46 = vpop.eup %1170  ;;  %535 = vadd.xlane.f32.xlu1 %v1169_v5 }
 0x168   : > { %1174 = vpow2.f32 %v427_v33  ;;  %533 = vadd.xlane.f32.xlu2 %v1171_v46  ;;  %v1173_v16 = vpop.eup %1172 }
 0x169   : > { %1176 = vpow2.f32 %v425_v55 }
 0x16a   : > { %v367_v49 = vpop.permute.xlu0 %366  ;;  %v387_v60 = vpop.permute.xlu2 %386 }
 0x16b   : > { %v408_v48 = vsub.f32 %v1579_v25, %v367_v49  ;;  %v362_v37 = vpop.permute.xlu1 %361  ;;  %v412_v36 = vsub.f32 %v1588_v30, %v387_v60 }
 0x16c   : > { %v407_v24 = vsub.f32 %v1574_v21, %v362_v37 }
 0x16d   : > { %v433_v38 = vmul.f32 1.442695, %v408_v48  ;;  %v441_v46 = vmul.f32 1.442695, %v412_v36 }
 0x16e   : > { %v1175_v62 = vpop.eup %1174  ;;  %v431_v12 = vmul.f32 1.442695, %v407_v24 }
 0x16f   : > { %v1177_v5 = vpop.eup %1176  ;;  %1178 = vpow2.f32 %v433_v38  ;;  %541 = vadd.xlane.f32.xlu1 %v1173_v16  ;;  %539 = vadd.xlane.f32.xlu0 %v1175_v62 }
 0x170   : > { %1180 = vpow2.f32 %v435_v23  ;;  %537 = vadd.xlane.f32.xlu2 %v1177_v5 }
 0x171   : > { %1182 = vpow2.f32 %v431_v12 }
 0x172   : > { %v382_v11 = vpop.permute.xlu0 %381  ;;  %1184 = vpow2.f32 %v441_v46 }
 0x173   : > { %v411_v61 = vsub.f32 %v1586_v29, %v382_v11  ;;  %v377_v55 = vpop.permute.xlu1 %376 }
 0x174   : > { %v410_v33 = vsub.f32 %v1583_v27, %v377_v55  ;;  %v610_v55 = vmax.f32 %v1552_v7, %v1563_v14 }
 0x175   : > { %v1179_v50 = vpop.eup %1178  ;;  %v439_v49 = vmul.f32 1.442695, %v411_v61 }
 0x176   : > { %v1181_v48 = vpop.eup %1180  ;;  %v437_v60 = vmul.f32 1.442695, %v410_v33  ;;  %v611_v33 = vmax.f32 %v1554_v8, %v1565_v15 }
 0x177   : > { %v1183_v37 = vpop.eup %1182  ;;  %1186 = vpow2.f32 %v439_v49  ;;  %547 = vadd.xlane.f32.xlu1 %v1181_v48  ;;  %545 = vadd.xlane.f32.xlu0 %v1179_v50  ;;  %v612_v50 = vmax.f32 %v1556_v9, %v1570_v19  ;;  %v613_v49 = vmax.f32 %v1561_v13, %v1572_v20  ;;  %v614_v48 = vmax.f32 %v610_v55, %v1574_v21 }
 0x178   : > { %1188 = vpow2.f32 %v437_v60  ;;  %543 = vadd.xlane.f32.xlu2 %v1183_v37  ;;  %v1185_v38 = vpop.eup %1184  ;;  %v615_v60 = vmax.f32 %v611_v33, %v1579_v25 }
 0x179   : > { %v616_v37 = vmax.f32 %v612_v50, %v1581_v26  ;;  %v1844_v50 = vld [vmem:[%s1841_s5] sm:$0x1] }
 0x17a   : > { %v397_v23 = vpop.permute.xlu0 %396 }
 0x17b   : > { %v414_v24 = vsub.f32 %v1592_v32, %v397_v23  ;;  %v392_v16 = vpop.permute.xlu1 %391  ;;  %v617_v23 = vmax.f32 %v613_v49, %v1583_v27 }
 0x17c   : > { %v413_v62 = vsub.f32 %v1590_v31, %v392_v16  ;;  %v619_v16 = vmax.f32 %v615_v60, %v1588_v30 }
 0x17d   : > { %v1187_v36 = vpop.eup %1186  ;;  %v445_v12 = vmul.f32 1.442695, %v414_v24  ;;  %v618_v24 = vmax.f32 %v614_v48, %v1586_v29 }
 0x17e   : > { %v1189_v5 = vpop.eup %1188  ;;  %v443_v11 = vmul.f32 1.442695, %v413_v62  ;;  %v621_v62 = vmax.f32 %v617_v23, %v1592_v32 }
 0x17f   : > { %1190 = vpow2.f32 %v445_v12  ;;  %553 = vadd.xlane.f32.xlu1 %v1185_v38  ;;  %551 = vadd.xlane.f32.xlu0 %v1187_v36  ;;  %v620_v38 = vmax.f32 %v616_v37, %v1590_v31  ;;  %v622_v36 = vmax.f32 %v618_v24, %v619_v16 }
 0x180   : > { %1192 = vpow2.f32 %v443_v11  ;;  %549 = vadd.xlane.f32.xlu2 %v1189_v5 }
 0x181   : > { %v623_v12 = vmax.f32 %v620_v38, %v621_v62 }
 0x183   : > { %v624_v5 = vmax.f32 %v622_v36, %v623_v12 }
 0x185   : > { %v1191_v46 = vpop.eup %1190  ;;  %v625_v11 = vrot.slane %v624_v5, 4 }
 0x186   : > { %v1193_v61 = vpop.eup %1192 }
 0x187   : > { %557 = vadd.xlane.f32.xlu0 %v1191_v46  ;;  %v626_v46 = vmax.f32 %v624_v5, %v625_v11  ;;  %v2066_v11 = vsub.f32 %v1677_v51, %v1684_v56 }
 0x188   : > { %555 = vadd.xlane.f32.xlu2 %v1193_v61 }
 0x189   : > { %v627_v61 = vrot.slane %v626_v46, 2 }
 0x18b   : > { %v628_v55 = vmax.f32 %v626_v46, %v627_v61  ;;  %v481_v46 = vmul.f32 1.442695, %v2066_v11 }
 0x18d   : > { %v629_v33 = vrot.slane %v628_v55, 1 }
 0x18f   : > { %v630_v2 = vmax.f32 %v628_v55, %v629_v33 }
 0x191   : > { %v1847_v49 = vmax.f32 %v1844_v50, %v630_v2 }
 0x193   : > { %v1850_v48 = vperm.slane %v1847_v49, 0  ;;  %712 = vst [vmem:[%s1841_s5] sm:$0x1] %v1847_v49 }
 0x195   : > { %v635_v60 = vsub.f32 %v1552_v7, %v1850_v48  ;;  %v636_v37 = vsub.f32 %v1554_v8, %v1850_v48  ;;  %v637_v23 = vsub.f32 %v1556_v9, %v1850_v48  ;;  %v638_v2 = vsub.f32 %v1561_v13, %v1850_v48 }
 0x196   : > { %v639_v62 = vsub.f32 %v1563_v14, %v1850_v48  ;;  %v640_v12 = vsub.f32 %v1565_v15, %v1850_v48  ;;  %v641_v55 = vsub.f32 %v1570_v19, %v1850_v48  ;;  %v643_v51 = vsub.f32 %v1574_v21, %v1850_v48  ;;  %v448_v21 = vld [vmem:[#allocation3 + $0x8] sm:$0xff] }
 0x197   : > { %v651_v24 = vmul.f32 1.442695, %v635_v60  ;;  %v653_v16 = vmul.f32 1.442695, %v636_v37  ;;  %v655_v38 = vmul.f32 1.442695, %v637_v23  ;;  %v642_v23 = vsub.f32 %v1572_v20, %v1850_v48 }
 0x198   : > { %v657_v36 = vmul.f32 1.442695, %v638_v2  ;;  %v659_v5 = vmul.f32 1.442695, %v639_v62  ;;  %v661_v33 = vmul.f32 1.442695, %v640_v12 }
 0x199   : > { %1194 = vpow2.f32 %v651_v24  ;;  %v663_v24 = vmul.f32 1.442695, %v641_v55  ;;  %v665_v56 = vmul.f32 1.442695, %v642_v23  ;;  %v667_v12 = vmul.f32 1.442695, %v643_v51 }
 0x19a   : > { %1196 = vpow2.f32 %v653_v16  ;;  %v645_v55 = vsub.f32 %v1581_v26, %v1850_v48 }
 0x19b   : > { %1198 = vpow2.f32 %v655_v38 }
 0x19c   : > { %1200 = vpow2.f32 %v657_v36  ;;  %v644_v36 = vsub.f32 %v1579_v25, %v1850_v48  ;;  %v671_v23 = vmul.f32 1.442695, %v645_v55 }
 0x19d   : > { %1202 = vpow2.f32 %v659_v5 }
 0x19e   : > { %1204 = vpow2.f32 %v661_v33 }
 0x19f   : > { %v1195_v61 = vpop.eup %1194  ;;  %1206 = vpow2.f32 %v481_v46  ;;  %v669_v46 = vmul.f32 1.442695, %v644_v36 }
 0x1a0   : > { %v1197_v60 = vpop.eup %1196  ;;  %1208 = vpow2.f32 %v663_v24 }
 0x1a1   : > { %v1199_v37 = vpop.eup %1198  ;;  %v689_v16 = vadd.f32 %v1197_v60, %v1195_v61  ;;  %1210 = vpow2.f32 %v665_v56 }
 0x1a2   : > { %v1201_v2 = vpop.eup %1200  ;;  %1212 = vpow2.f32 %v667_v12 }
 0x1a3   : > { %v690_v38 = vadd.f32 %v1199_v37, %v689_v16  ;;  %v1203_v62 = vpop.eup %1202  ;;  %v646_v37 = vsub.f32 %v1583_v27, %v1850_v48  ;;  %1214 = vpow2.f32 %v669_v46 }
 0x1a4   : > { %v1205_v11 = vpop.eup %1204  ;;  %1216 = vpow2.f32 %v671_v23 }
 0x1a5   : > { %v691_v5 = vadd.f32 %v1201_v2, %v690_v38  ;;  %v1207_v33 = vpop.eup %1206  ;;  %v647_v2 = vsub.f32 %v1586_v29, %v1850_v48  ;;  %v673_v51 = vmul.f32 1.442695, %v646_v37  ;;  %v650_v37 = vsub.f32 %v1592_v32, %v1850_v48 }
 0x1a6   : > { %v1209_v60 = vpop.eup %1208  ;;  %v512_v38 = vmul.f32 %v1207_v33, %v448_v21 }
 0x1a7   : > { %v692_v61 = vadd.f32 %v1203_v62, %v691_v5  ;;  %v1211_v16 = vpop.eup %1210  ;;  %v648_v62 = vsub.f32 %v1588_v30, %v1850_v48  ;;  %1218 = vpow2.f32 %v673_v51  ;;  %v675_v36 = vmul.f32 1.442695, %v647_v2 }
 0x1a8   : > { %v1213_v12 = vpop.eup %1212  ;;  %v681_v51 = vmul.f32 1.442695, %v650_v37 }
 0x1a9   : > { %v693_v24 = vadd.f32 %v1205_v11, %v692_v61  ;;  %v1215_v27 = vpop.eup %1214  ;;  %v649_v11 = vsub.f32 %v1590_v31, %v1850_v48  ;;  %1220 = vpow2.f32 %v675_v36  ;;  %v677_v55 = vmul.f32 1.442695, %v648_v62 }
 0x1aa   : > { %v2067_v61 = vsub.f32 %v1648_v39, %v1655_v44  ;;  %v1217_v33 = vpop.eup %1216  ;;  %v2069_v48 = vsub.f32 %v1652_v41, %v1661_v47 }
 0x1ab   : > { %v694_v56 = vadd.f32 %v1209_v60, %v693_v24  ;;  %1222 = vpow2.f32 %v677_v55  ;;  %v679_v23 = vmul.f32 1.442695, %v649_v11 }
 0x1ac   : > { %v483_v60 = vmul.f32 1.442695, %v2067_v61  ;;  %v487_v36 = vmul.f32 1.442695, %v2069_v48  ;;  %v447_v61 = vld [vmem:[#allocation3] sm:$0xff] }
 0x1ad   : > { %v695_v5 = vadd.f32 %v1211_v16, %v694_v56  ;;  %v1219_v2 = vpop.eup %1218  ;;  %1224 = vpow2.f32 %v679_v23 }
 0x1ae   : > { %1226 = vpow2.f32 %v483_v60 }
 0x1af   : > { %v696_v21 = vadd.f32 %v1213_v12, %v695_v5  ;;  %v1221_v44 = vpop.eup %1220  ;;  %1228 = vpow2.f32 %v681_v51 }
 0x1b1   : > { %v697_v16 = vadd.f32 %v1215_v27, %v696_v21  ;;  %v2070_v27 = vsub.f32 %v1679_v52, %v1687_v58  ;;  %v2071_v52 = vsub.f32 %v1706_v63, %v1713_v4  ;;  %v451_v63 = vld [vmem:[#allocation3 + $0x20] sm:$0xff] }
 0x1b3   : > { %v698_v39 = vadd.f32 %v1217_v33, %v697_v16  ;;  %v685_v33 = vsub.f32 %v1844_v50, %v1847_v49  ;;  %v491_v58 = vmul.f32 1.442695, %v2071_v52  ;;  %v2073_v50 = vsub.f32 %v1681_v53, %v1690_v59  ;;  %v684_v53 = vld [vmem:[%s1916_s6] sm:$0x1] }
 0x1b4   : > { %v2074_v59 = vsub.f32 %v1735_v17, %v1742_v28  ;;  %v453_v28 = vld [vmem:[#allocation3 + $0x30] sm:$0xff] }
 0x1b5   : > { %v699_v56 = vadd.f32 %v1219_v2, %v698_v39  ;;  %v2072_v2 = vsub.f32 %v1708_v0, %v1716_v6  ;;  %v489_v49 = vmul.f32 1.442695, %v2073_v50 }
 0x1b7   : > { %v700_v12 = vadd.f32 %v1221_v44, %v699_v56  ;;  %v493_v51 = vmul.f32 1.442695, %v2072_v2 }
 0x1c1   : > { %v530_v26 = vpop.xlane.xlu1 %529 }
 0x1c2   : > { %v560_v46 = vadd.f32 %v530_v26, %v512_v38  ;;  %v2068_v26 = vsub.f32 %v1650_v40, %v1658_v45  ;;  %v1223_v38 = vpop.eup %1222  ;;  %v485_v40 = vmul.f32 1.442695, %v2070_v27  ;;  %v449_v45 = vld [vmem:[#allocation3 + $0x10] sm:$0xff] }
 0x1c3   : > { %v1225_v62 = vpop.eup %1224 }
 0x1c4   : > { %577 = vst.msk [vmem:[#allocation3 + $0x8] sm:$0xff] %vm575_vm2, %v560_v46  ;;  %v479_v24 = vmul.f32 1.442695, %v2068_v26  ;;  %v1227_v5 = vpop.eup %1226  ;;  %v701_v46 = vadd.f32 %v1223_v38, %v700_v12  ;;  %v686_v26 = vmul.f32 1.442695, %v685_v33  ;;  %v450_v38 = vld [vmem:[#allocation3 + $0x18] sm:$0xff] }
 0x1c5   : > { %v1229_v11 = vpop.eup %1228  ;;  %v513_v21 = vmul.f32 %v1227_v5, %v449_v45  ;;  %v497_v5 = vmul.f32 1.442695, %v2074_v59 }
 0x1c6   : > { %1230 = vpow2.f32 %v479_v24  ;;  %v702_v60 = vadd.f32 %v1225_v62, %v701_v46 }
 0x1c7   : > { %1232 = vpow2.f32 %v487_v36 }
 0x1c8   : > { %1234 = vpow2.f32 %v485_v40  ;;  %v703_v41 = vadd.f32 %v1229_v11, %v702_v60  ;;  %v2075_v11 = vsub.f32 %v1737_v18, %v1745_v34 }
 0x1c9   : > { %1236 = vpow2.f32 %v686_v26 }
 0x1ca   : > { %v704_v16 = vrot.slane %v703_v41, 4  ;;  %1238 = vpow2.f32 %v491_v58  ;;  %v2077_v58 = vsub.f32 %v1765_v42, %v1772_v57  ;;  %v456_v42 = vld [vmem:[#allocation3 + $0x48] sm:$0xff]  ;;  %v457_v57 = vld [vmem:[#allocation3 + $0x50] sm:$0xff] }
 0x1cb   : > { %1240 = vpow2.f32 %v493_v51 }
 0x1cc   : > { %v1231_v55 = vpop.eup %1230  ;;  %v705_v44 = vadd.f32 %v704_v16, %v703_v41  ;;  %1242 = vpow2.f32 %v489_v49  ;;  %v454_v41 = vld [vmem:[#allocation3 + $0x38] sm:$0xff] }
 0x1cd   : > { %v511_v23 = vmul.f32 %v1231_v55, %v447_v61  ;;  %v1233_v56 = vpop.eup %1232  ;;  %v499_v55 = vmul.f32 1.442695, %v2075_v11  ;;  %1244 = vpow2.f32 %v497_v5 }
 0x1ce   : > { %v1235_v4 = vpop.eup %1234  ;;  %v706_v12 = vrot.slane %v705_v44, 2  ;;  %v515_v0 = vmul.f32 %v1233_v56, %v451_v63  ;;  %v2079_v56 = vsub.f32 %v1739_v22, %v1748_v35 }
 0x1cf   : > { %v1237_v62 = vpop.eup %1236  ;;  %v514_v48 = vmul.f32 %v1235_v4, %v450_v38  ;;  %1246 = vpow2.f32 %v499_v55 }
 0x1d0   : > { %v707_v6 = vadd.f32 %v706_v12, %v705_v44  ;;  %v688_v45 = vmul.f32 %v1237_v62, %v684_v53  ;;  %v1239_v60 = vpop.eup %1238  ;;  %v501_v63 = vmul.f32 1.442695, %v2079_v56  ;;  %v455_v12 = vld [vmem:[#allocation3 + $0x40] sm:$0xff] }
 0x1d1   : > { %v532_v37 = vpop.xlane.xlu0 %531  ;;  %v1241_v17 = vpop.eup %1240  ;;  %v517_v34 = vmul.f32 %v1239_v60, %v453_v28  ;;  %v460_v60 = vld [vmem:[#allocation3 + $0x68] sm:$0xff] }
 0x1d2   : > { %v561_v47 = vadd.f32 %v532_v37, %v513_v21  ;;  %v528_v24 = vpop.xlane.xlu2 %527  ;;  %v708_v46 = vrot.slane %v707_v6, 1  ;;  %v2076_v21 = vsub.f32 %v1710_v1, %v1719_v10  ;;  %v518_v26 = vmul.f32 %v1241_v17, %v454_v41 }
 0x1d3   : > { %v559_v39 = vadd.f32 %v528_v24, %v511_v23  ;;  %v452_v23 = vld [vmem:[#allocation3 + $0x28] sm:$0xff]  ;;  %v503_v24 = vmul.f32 1.442695, %v2077_v58 }
 0x1d4   : > { %578 = vst.msk [vmem:[#allocation3 + $0x10] sm:$0xff] %vm575_vm2, %v561_v47  ;;  %v495_v33 = vmul.f32 1.442695, %v2076_v21  ;;  %v709_v37 = vadd.f32 %v708_v46, %v707_v6  ;;  %v1243_v47 = vpop.eup %1242 }
 0x1d5   : > { %576 = vst.msk [vmem:[#allocation3] sm:$0xff] %vm575_vm2, %v559_v39  ;;  %v516_v1 = vmul.f32 %v1243_v47, %v452_v23  ;;  %v2078_v39 = vsub.f32 %v1767_v43, %v1775_v3  ;;  %v1245_v44 = vpop.eup %1244 }
 0x1d6   : > { %v710_v18 = vadd.f32 %v709_v37, %v688_v45  ;;  %1248 = vpow2.f32 %v495_v33  ;;  %v1247_v4 = vpop.eup %1246  ;;  %v520_v43 = vmul.f32 %v1245_v44, %v456_v42  ;;  %v2083_v45 = vld [vmem:[#allocation18_spill] sm:$0xff]  ;;  %v458_v33 = vld [vmem:[#allocation3 + $0x58] sm:$0xff] }
 0x1d7   : > { %v505_v50 = vmul.f32 1.442695, %v2078_v39  ;;  %1250 = vpow2.f32 %v503_v24  ;;  %v521_v3 = vmul.f32 %v1247_v4, %v457_v57 }
 0x1d8   : > { %711 = vst [vmem:[%s1916_s6] sm:$0x1] %v710_v18 }
 0x1d9   : > { %1252 = vpow2.f32 %v505_v50 }
 0x1da   : > { %v536_v36 = vpop.xlane.xlu1 %535  ;;  %1254 = vpow2.f32 %v501_v63 }
 0x1db   : > { %v534_v27 = vpop.xlane.xlu2 %533  ;;  %v563_v40 = vadd.f32 %v536_v36, %v515_v0  ;;  %v2080_v36 = vld [vmem:[#allocation19_spill] sm:$0xff] }
 0x1dc   : > { %v562_v61 = vadd.f32 %v534_v27, %v514_v48  ;;  %v1249_v38 = vpop.eup %1248  ;;  %v2081_v53 = vsub.f32 %v1795_v54, %v2080_v36 }
 0x1dd   : > { %580 = vst.msk [vmem:[#allocation3 + $0x20] sm:$0xff] %vm575_vm2, %v563_v40  ;;  %v519_v6 = vmul.f32 %v1249_v38, %v455_v12  ;;  %v1251_v27 = vpop.eup %1250  ;;  %v2082_v40 = vld [vmem:[#allocation17_spill] sm:$0xff] }
 0x1de   : > { %579 = vst.msk [vmem:[#allocation3 + $0x18] sm:$0xff] %vm575_vm2, %v562_v61  ;;  %v509_v59 = vmul.f32 1.442695, %v2081_v53  ;;  %v2084_v46 = vsub.f32 %v2082_v40, %v2083_v45  ;;  %v459_v61 = vld [vmem:[#allocation3 + $0x60] sm:$0xff] }
 0x1df   : > { %v1253_v55 = vpop.eup %1252  ;;  %v523_v54 = vmul.f32 %v1251_v27, %v459_v61 }
 0x1e0   : > { %v507_v11 = vmul.f32 1.442695, %v2084_v46  ;;  %v1255_v21 = vpop.eup %1254  ;;  %1256 = vpow2.f32 %v509_v59  ;;  %v524_v37 = vmul.f32 %v1253_v55, %v460_v60 }
 0x1e1   : > { %v522_v28 = vmul.f32 %v1255_v21, %v458_v33 }
 0x1e2   : > { %v540_v10 = vpop.xlane.xlu0 %539  ;;  %v542_v52 = vpop.xlane.xlu1 %541  ;;  %1258 = vpow2.f32 %v507_v11 }
 0x1e3   : > { %v538_v16 = vpop.xlane.xlu2 %537  ;;  %v565_v2 = vadd.f32 %v540_v10, %v517_v34  ;;  %v566_v51 = vadd.f32 %v542_v52, %v518_v26  ;;  %v461_v52 = vld [vmem:[#allocation3 + $0x70] sm:$0xff] }
 0x1e4   : > { %v564_v49 = vadd.f32 %v538_v16, %v516_v1  ;;  %v462_v1 = vld [vmem:[#allocation3 + $0x78] sm:$0xff] }
 0x1e5   : > { %582 = vst.msk [vmem:[#allocation3 + $0x30] sm:$0xff] %vm575_vm2, %v565_v2 }
 0x1e6   : > { %581 = vst.msk [vmem:[#allocation3 + $0x28] sm:$0xff] %vm575_vm2, %v564_v49  ;;  %v1257_v26 = vpop.eup %1256 }
 0x1e7   : > { %583 = vst.msk [vmem:[#allocation3 + $0x38] sm:$0xff] %vm575_vm2, %v566_v51  ;;  %v526_v58 = vmul.f32 %v1257_v26, %v462_v1 }
 0x1e8   : > { %v1259_v10 = vpop.eup %1258 }
 0x1e9   : > { %v525_v16 = vmul.f32 %v1259_v10, %v461_v52 }
 0x1ea   : > { %v546_v0 = vpop.xlane.xlu0 %545  ;;  %v548_v22 = vpop.xlane.xlu1 %547 }
 0x1eb   : > { %v568_v35 = vadd.f32 %v546_v0, %v520_v43  ;;  %v544_v62 = vpop.xlane.xlu2 %543  ;;  %v569_v48 = vadd.f32 %v548_v22, %v521_v3 }
 0x1ec   : > { %v567_v5 = vadd.f32 %v544_v62, %v519_v6 }
 0x1ed   : > { %585 = vst.msk [vmem:[#allocation3 + $0x48] sm:$0xff] %vm575_vm2, %v568_v35 }
 0x1ee   : > { %584 = vst.msk [vmem:[#allocation3 + $0x40] sm:$0xff] %vm575_vm2, %v567_v5 }
 0x1ef   : > { %586 = vst.msk [vmem:[#allocation3 + $0x50] sm:$0xff] %vm575_vm2, %v569_v48 }
 0x1f2   : > { %v552_v17 = vpop.xlane.xlu0 %551  ;;  %v554_v41 = vpop.xlane.xlu1 %553 }
 0x1f3   : > { %v571_v47 = vadd.f32 %v552_v17, %v523_v54  ;;  %v550_v23 = vpop.xlane.xlu2 %549  ;;  %v572_v18 = vadd.f32 %v554_v41, %v524_v37 }
 0x1f4   : > { %v570_v34 = vadd.f32 %v550_v23, %v522_v28 }
 0x1f5   : > { %588 = vst.msk [vmem:[#allocation3 + $0x60] sm:$0xff] %vm575_vm2, %v571_v47 }
 0x1f6   : > { %587 = vst.msk [vmem:[#allocation3 + $0x58] sm:$0xff] %vm575_vm2, %v570_v34 }
 0x1f7   : > { %589 = vst.msk [vmem:[#allocation3 + $0x68] sm:$0xff] %vm575_vm2, %v572_v18 }
 0x1fa   : > { %v558_v24 = vpop.xlane.xlu0 %557  ;;  %716 = sbr.rel (%p1064_p5) target bundleno = 692 (0x2b4), region = 48 }
 0x1fb   : > { %v574_v2 = vadd.f32 %v558_v24, %v526_v58  ;;  %v556_v51 = vpop.xlane.xlu2 %555 }
 0x1fc   : > { %v573_v39 = vadd.f32 %v556_v51, %v525_v16 }
 0x1fd   : > { %591 = vst.msk [vmem:[#allocation3 + $0x78] sm:$0xff] %vm575_vm2, %v574_v2 }
 0x1fe   : > { %590 = vst.msk [vmem:[#allocation3 + $0x70] sm:$0xff] %vm575_vm2, %v573_v39 }
 0x1ff   : > { %v717_v50 = vlaneseq  ;;  %v2085_v62 = vld [vmem:[#allocation14_spill] sm:$0xff]  ;;  %v2087_v5 = vld [vmem:[#allocation16_spill] sm:$0xff] }
 0x201   : > { %v718_v49 = vshrl.u32 %v717_v50, 7  ;;  %v1959_v44 = vand.u32 127, %v717_v50 }
 0x203   : > { %vm736_vm3 = vcmp.eq.s32.totalorder %v718_v49, %v1959_v44  ;;  %v720_v56 = vadd.s32 16, %v718_v49  ;;  %v722_v63 = vadd.s32 32, %v718_v49  ;;  %v719_v4 = vadd.s32 8, %v718_v49 }
 0x204   : > { %v752_v42 = vsel %vm736_vm3, %v1552_v7, 0.0  ;;  %v721_v57 = vadd.s32 24, %v718_v49  ;;  %v723_v38 = vadd.s32 40, %v718_v49  ;;  %v724_v3 = vadd.s32 48, %v718_v49 }
 0x205   : > { %768 = vadd.xlane.f32.xlu0 %v752_v42  ;;  %vm738_vm4 = vcmp.eq.s32.totalorder %v720_v56, %v1959_v44  ;;  %vm740_vm5 = vcmp.eq.s32.totalorder %v722_v63, %v1959_v44  ;;  %vm737_vm6 = vcmp.eq.s32.totalorder %v719_v4, %v1959_v44  ;;  %v725_v22 = vadd.s32 56, %v718_v49 }
 0x206   : > { %v754_v12 = vsel %vm738_vm4, %v1556_v9, 0.0  ;;  %v756_v43 = vsel %vm740_vm5, %v1563_v14, 0.0  ;;  %vm739_vm7 = vcmp.eq.s32.totalorder %v721_v57, %v1959_v44  ;;  %vm741_vm8 = vcmp.eq.s32.totalorder %v723_v38, %v1959_v44 }
 0x207   : > { %772 = vadd.xlane.f32.xlu1 %v754_v12  ;;  %776 = vadd.xlane.f32.xlu2 %v756_v43  ;;  %v753_v7 = vsel %vm737_vm6, %v1554_v8, 0.0  ;;  %v755_v0 = vsel %vm739_vm7, %v1561_v13, 0.0  ;;  %v757_v6 = vsel %vm741_vm8, %v1565_v15, 0.0  ;;  %v726_v9 = vadd.s32 64, %v718_v49  ;;  %v821_v43 = vld [vmem:[#allocation6] sm:$0x1] }
 0x208   : > { %vm742_vm9 = vcmp.eq.s32.totalorder %v724_v3, %v1959_v44  ;;  %vm743_vm10 = vcmp.eq.s32.totalorder %v725_v22, %v1959_v44  ;;  %v727_v35 = vadd.s32 72, %v718_v49  ;;  %v728_v15 = vadd.s32 80, %v718_v49 }
 0x209   : > { %vm744_vm11 = vcmp.eq.s32.totalorder %v726_v9, %v1959_v44  ;;  %v758_v14 = vsel %vm742_vm9, %v1570_v19, 0.0  ;;  %v759_v8 = vsel %vm743_vm10, %v1572_v20, 0.0  ;;  %v729_v48 = vadd.s32 88, %v718_v49  ;;  %v2086_v19 = vld [vmem:[#allocation15_spill] sm:$0xff] }
 0x20a   : > { %v760_v13 = vsel %vm744_vm11, %v2085_v62, 0.0  ;;  %vm745_vm12 = vcmp.eq.s32.totalorder %v727_v35, %v1959_v44  ;;  %vm746_vm13 = vcmp.eq.s32.totalorder %v728_v15, %v1959_v44  ;;  %v730_v53 = vadd.s32 96, %v718_v49 }
 0x20b   : > { %vm747_vm14 = vcmp.eq.s32.totalorder %v729_v48, %v1959_v44  ;;  %v761_v36 = vsel %vm745_vm12, %v1579_v25, 0.0  ;;  %v762_v59 = vsel %vm746_vm13, %v2086_v19, 0.0  ;;  %v731_v27 = vadd.s32 104, %v718_v49 }
 0x20c   : > { %v763_v20 = vsel %vm747_vm14, %v2087_v5, 0.0  ;;  %v732_v40 = vadd.s32 112, %v718_v49  ;;  %vm748_vm15 = vcmp.eq.s32.totalorder %v730_v53, %v1959_v44  ;;  %v733_v46 = vadd.s32 120, %v718_v49 }
 0x20d   : > { %770 = vadd.xlane.f32.xlu0 %v753_v7  ;;  %vm749_vm0 = vcmp.eq.s32.totalorder %v731_v27, %v1959_v44  ;;  %v764_v45 = vsel %vm748_vm15, %v1586_v29, 0.0  ;;  %vm824_vm4 = vcmask 0  }
 0x20e   : > { %vm750_vm1 = vcmp.eq.s32.totalorder %v732_v40, %v1959_v44  ;;  %v765_v25 = vsel %vm749_vm0, %v1588_v30, 0.0  ;;  %vm751_vm3 = vcmp.eq.s32.totalorder %v733_v46, %v1959_v44 }
 0x20f   : > { %774 = vadd.xlane.f32.xlu1 %v755_v0  ;;  %778 = vadd.xlane.f32.xlu2 %v757_v6  ;;  %v766_v11 = vsel %vm750_vm1, %v1590_v31, 0.0  ;;  %v767_v55 = vsel %vm751_vm3, %v1592_v32, 0.0 }
 0x215   : > { %780 = vadd.xlane.f32.xlu0 %v758_v14 }
 0x217   : > { %782 = vadd.xlane.f32.xlu1 %v759_v8  ;;  %784 = vadd.xlane.f32.xlu2 %v760_v13 }
 0x21d   : > { %786 = vadd.xlane.f32.xlu0 %v761_v36 }
 0x21f   : > { %788 = vadd.xlane.f32.xlu1 %v762_v59  ;;  %790 = vadd.xlane.f32.xlu2 %v763_v20 }
 0x225   : > { %792 = vadd.xlane.f32.xlu0 %v764_v45 }
 0x227   : > { %794 = vadd.xlane.f32.xlu1 %v765_v25  ;;  %796 = vadd.xlane.f32.xlu2 %v766_v11 }
 0x22d   : > { %798 = vadd.xlane.f32.xlu0 %v767_v55 }
 0x278   : > { %v769_v61 = vpop.xlane.xlu0 %768 }
 0x27a   : > { %v773_v60 = vpop.xlane.xlu1 %772  ;;  %v777_v21 = vpop.xlane.xlu2 %776 }
 0x280   : > { %v771_v33 = vpop.xlane.xlu0 %770 }
 0x281   : > { %v800_v54 = vadd.f32 %v771_v33, %v769_v61 }
 0x282   : > { %v775_v37 = vpop.xlane.xlu1 %774  ;;  %v779_v29 = vpop.xlane.xlu2 %778 }
 0x283   : > { %v801_v17 = vadd.f32 %v800_v54, %v773_v60 }
 0x285   : > { %v802_v28 = vadd.f32 %v801_v17, %v775_v37 }
 0x287   : > { %v803_v30 = vadd.f32 %v802_v28, %v777_v21 }
 0x288   : > { %v781_v41 = vpop.xlane.xlu0 %780 }
 0x289   : > { %v804_v31 = vadd.f32 %v803_v30, %v779_v29 }
 0x28a   : > { %v783_v47 = vpop.xlane.xlu1 %782  ;;  %v785_v23 = vpop.xlane.xlu2 %784 }
 0x28b   : > { %v805_v18 = vadd.f32 %v804_v31, %v781_v41 }
 0x28d   : > { %v806_v34 = vadd.f32 %v805_v18, %v783_v47 }
 0x28f   : > { %v807_v26 = vadd.f32 %v806_v34, %v785_v23 }
 0x290   : > { %v787_v1 = vpop.xlane.xlu0 %786 }
 0x291   : > { %v808_v32 = vadd.f32 %v807_v26, %v787_v1 }
 0x292   : > { %v789_v10 = vpop.xlane.xlu1 %788  ;;  %v791_v52 = vpop.xlane.xlu2 %790 }
 0x293   : > { %v809_v58 = vadd.f32 %v808_v32, %v789_v10 }
 0x295   : > { %v810_v24 = vadd.f32 %v809_v58, %v791_v52 }
 0x298   : > { %v793_v16 = vpop.xlane.xlu0 %792 }
 0x299   : > { %v811_v2 = vadd.f32 %v810_v24, %v793_v16 }
 0x29a   : > { %v795_v51 = vpop.xlane.xlu1 %794  ;;  %v797_v50 = vpop.xlane.xlu2 %796 }
 0x29b   : > { %v812_v39 = vadd.f32 %v811_v2, %v795_v51 }
 0x29d   : > { %v813_v49 = vadd.f32 %v812_v39, %v797_v50 }
 0x2a0   : > { %v799_v44 = vpop.xlane.xlu0 %798 }
 0x2a1   : > { %v814_v56 = vadd.f32 %v813_v49, %v799_v44 }
 0x2a3   : > { %v815_v63 = vrot.slane %v814_v56, 4 }
 0x2a5   : > { %v816_v4 = vadd.f32 %v815_v63, %v814_v56 }
 0x2a7   : > { %v817_v42 = vrot.slane %v816_v4, 2 }
 0x2a9   : > { %v818_v57 = vadd.f32 %v817_v42, %v816_v4 }
 0x2ab   : > { %v819_v38 = vrot.slane %v818_v57, 1 }
 0x2ad   : > { %v820_v12 = vadd.f32 %v819_v38, %v818_v57 }
 0x2af   : > { %v822_v7 = vmul.f32 2.0, %v820_v12 }
 0x2b1   : > { %v823_v3 = vsub.f32 %v821_v43, %v822_v7 }
 0x2b3   : > { %825 = vst.msk [vmem:[#allocation6] sm:$0x1] %vm824_vm4, %v823_v3 }
 0x2b4 PF: > { %p826_p6 = scmp.eq.s32.totalorder %s1406_s14, 1  ;;  %p1065_p7 = scmp.ne.s32.totalorder %s1406_s14, 1 }
 0x2b6   : > { %829 = sbr.rel (%p1065_p7) target bundleno = 758 (0x2f6), region = 52 }
 0x2bb   : > { %v830_v0 = vld [vmem:[#allocation3] sm:$0xff]  ;;  %v831_v6 = vld [vmem:[#allocation3 + $0x8] sm:$0xff]  ;;  %v832_v22 = vld [vmem:[#allocation3 + $0x10] sm:$0xff]  ;;  %vm949_vm5 = vcmask 0  }
 0x2bc   : > { %v833_v9 = vld [vmem:[#allocation3 + $0x18] sm:$0xff]  ;;  %1260 = vlog2.f32 %v830_v0  ;;  %v834_v14 = vld [vmem:[#allocation3 + $0x20] sm:$0xff]  ;;  %v835_v35 = vld [vmem:[#allocation3 + $0x28] sm:$0xff] }
 0x2bd   : > { %1262 = vlog2.f32 %v831_v6  ;;  %v836_v8 = vld [vmem:[#allocation3 + $0x30] sm:$0xff]  ;;  %v837_v62 = vld [vmem:[#allocation3 + $0x38] sm:$0xff]  ;;  %v838_v13 = vld [vmem:[#allocation3 + $0x40] sm:$0xff] }
 0x2be   : > { %1264 = vlog2.f32 %v832_v22  ;;  %v839_v48 = vld [vmem:[#allocation3 + $0x48] sm:$0xff]  ;;  %v878_v36 = vld [vmem:[#allocation2] sm:$0xff]  ;;  %v840_v20 = vld [vmem:[#allocation3 + $0x50] sm:$0xff] }
 0x2bf   : > { %1266 = vlog2.f32 %v833_v9  ;;  %v879_v59 = vld [vmem:[#allocation2 + $0x8] sm:$0xff]  ;;  %v880_v40 = vld [vmem:[#allocation2 + $0x10] sm:$0xff]  ;;  %v881_v25 = vld [vmem:[#allocation2 + $0x18] sm:$0xff] }
 0x2c0   : > { %1268 = vlog2.f32 %v834_v14  ;;  %v841_v61 = vld [vmem:[#allocation3 + $0x58] sm:$0xff]  ;;  %v882_v21 = vld [vmem:[#allocation2 + $0x20] sm:$0xff]  ;;  %v883_v29 = vld [vmem:[#allocation2 + $0x28] sm:$0xff] }
 0x2c1   : > { %1270 = vlog2.f32 %v835_v35  ;;  %v842_v41 = vld [vmem:[#allocation3 + $0x60] sm:$0xff]  ;;  %v884_v26 = vld [vmem:[#allocation2 + $0x30] sm:$0xff]  ;;  %v843_v52 = vld [vmem:[#allocation3 + $0x68] sm:$0xff] }
 0x2c2   : > { %v1261_v15 = vpop.eup %1260  ;;  %1272 = vlog2.f32 %v836_v8  ;;  %v885_v51 = vld [vmem:[#allocation2 + $0x38] sm:$0xff]  ;;  %v844_v50 = vld [vmem:[#allocation3 + $0x70] sm:$0xff]  ;;  %v886_v42 = vld [vmem:[#allocation2 + $0x40] sm:$0xff] }
 0x2c3   : > { %v1263_v53 = vpop.eup %1262  ;;  %v847_v19 = vmul.f32 0.6931472, %v1261_v15  ;;  %1274 = vlog2.f32 %v837_v62  ;;  %v845_v38 = vld [vmem:[#allocation3 + $0x78] sm:$0xff]  ;;  %v887_v0 = vld [vmem:[#allocation2 + $0x48] sm:$0xff]  ;;  %v888_v8 = vld [vmem:[#allocation2 + $0x50] sm:$0xff] }
 0x2c4   : > { %v1265_v5 = vpop.eup %1264  ;;  %v849_v27 = vmul.f32 0.6931472, %v1263_v53  ;;  %1276 = vlog2.f32 %v838_v13  ;;  %v889_v53 = vld [vmem:[#allocation2 + $0x58] sm:$0xff] }
 0x2c5   : > { %v1267_v45 = vpop.eup %1266  ;;  %v851_v46 = vmul.f32 0.6931472, %v1265_v5  ;;  %1278 = vlog2.f32 %v839_v48  ;;  %v894_v11 = vadd.f32 %v878_v36, %v847_v19 }
 0x2c6   : > { %v1269_v55 = vpop.eup %1268  ;;  %v853_v60 = vmul.f32 0.6931472, %v1267_v45  ;;  %v895_v33 = vadd.f32 %v879_v59, %v849_v27  ;;  %1280 = vlog2.f32 %v840_v20 }
 0x2c7   : > { %v1271_v54 = vpop.eup %1270  ;;  %v855_v37 = vmul.f32 0.6931472, %v1269_v55  ;;  %v896_v17 = vadd.f32 %v880_v40, %v851_v46  ;;  %v911_v28 = vsel %vm575_vm2, %v894_v11, 0.0  ;;  %1282 = vlog2.f32 %v841_v61  ;;  %v890_v40 = vld [vmem:[#allocation2 + $0x60] sm:$0xff]  ;;  %v891_v61 = vld [vmem:[#allocation2 + $0x68] sm:$0xff] }
 0x2c8   : > { %v1273_v30 = vpop.eup %1272  ;;  %v857_v31 = vmul.f32 0.6931472, %v1271_v54  ;;  %v897_v47 = vadd.f32 %v881_v25, %v853_v60  ;;  %v912_v23 = vsel %vm575_vm2, %v895_v33, 0.0  ;;  %1284 = vlog2.f32 %v842_v41  ;;  %v893_v41 = vld [vmem:[#allocation2 + $0x78] sm:$0xff] }
 0x2c9   : > { %v1275_v18 = vpop.eup %1274  ;;  %v859_v34 = vmul.f32 0.6931472, %v1273_v30  ;;  %v898_v1 = vadd.f32 %v882_v21, %v855_v37  ;;  %v913_v32 = vadd.f32 %v912_v23, %v911_v28  ;;  %v914_v16 = vsel %vm575_vm2, %v896_v17, 0.0  ;;  %v892_v37 = vld [vmem:[#allocation2 + $0x70] sm:$0xff] }
 0x2ca   : > { %v1277_v10 = vpop.eup %1276  ;;  %v861_v58 = vmul.f32 0.6931472, %v1275_v18  ;;  %v899_v24 = vadd.f32 %v883_v29, %v857_v31  ;;  %v916_v56 = vsel %vm575_vm2, %v897_v47, 0.0  ;;  %1286 = vlog2.f32 %v843_v52 }
 0x2cb   : > { %v1279_v2 = vpop.eup %1278  ;;  %v915_v39 = vadd.f32 %v914_v16, %v913_v32  ;;  %v863_v49 = vmul.f32 0.6931472, %v1277_v10  ;;  %v900_v44 = vadd.f32 %v884_v26, %v859_v34  ;;  %v918_v63 = vsel %vm575_vm2, %v898_v1, 0.0 }
 0x2cc   : > { %v1281_v4 = vpop.eup %1280  ;;  %v865_v12 = vmul.f32 0.6931472, %v1279_v2  ;;  %v901_v43 = vadd.f32 %v885_v51, %v861_v58  ;;  %v920_v7 = vsel %vm575_vm2, %v899_v24, 0.0  ;;  %1288 = vlog2.f32 %v844_v50 }
 0x2cd   : > { %v917_v57 = vadd.f32 %v916_v56, %v915_v39  ;;  %v1283_v3 = vpop.eup %1282  ;;  %v867_v22 = vmul.f32 0.6931472, %v1281_v4  ;;  %v902_v9 = vadd.f32 %v886_v42, %v863_v49  ;;  %v922_v14 = vsel %vm575_vm2, %v900_v44, 0.0  ;;  %v910_v49 = vld [vmem:[#allocation6] sm:$0x1] }
 0x2ce   : > { %v1285_v35 = vpop.eup %1284  ;;  %1290 = vlog2.f32 %v845_v38  ;;  %v869_v13 = vmul.f32 0.6931472, %v1283_v3  ;;  %v903_v15 = vadd.f32 %v887_v0, %v865_v12  ;;  %v924_v48 = vsel %vm575_vm2, %v901_v43, 0.0 }
 0x2cf   : > { %v919_v6 = vadd.f32 %v918_v63, %v917_v57  ;;  %v871_v59 = vmul.f32 0.6931472, %v1285_v35  ;;  %v904_v5 = vadd.f32 %v888_v8, %v867_v22  ;;  %v926_v20 = vsel %vm575_vm2, %v902_v9, 0.0 }
 0x2d0   : > { %v1287_v36 = vpop.eup %1286  ;;  %v905_v25 = vadd.f32 %v889_v53, %v869_v13  ;;  %v928_v11 = vsel %vm575_vm2, %v903_v15, 0.0 }
 0x2d1   : > { %v921_v62 = vadd.f32 %v920_v7, %v919_v6  ;;  %v873_v46 = vmul.f32 0.6931472, %v1287_v36  ;;  %v906_v33 = vadd.f32 %v890_v40, %v871_v59  ;;  %v930_v54 = vsel %vm575_vm2, %v904_v5, 0.0 }
 0x2d2   : > { %v1289_v27 = vpop.eup %1288  ;;  %v932_v30 = vsel %vm575_vm2, %v905_v25, 0.0 }
 0x2d3   : > { %v923_v19 = vadd.f32 %v922_v14, %v921_v62  ;;  %v875_v21 = vmul.f32 0.6931472, %v1289_v27  ;;  %v907_v28 = vadd.f32 %v891_v61, %v873_v46  ;;  %v934_v23 = vsel %vm575_vm2, %v906_v33, 0.0 }
 0x2d4   : > { %v1291_v55 = vpop.eup %1290 }
 0x2d5   : > { %v925_v45 = vadd.f32 %v924_v48, %v923_v19  ;;  %v877_v17 = vmul.f32 0.6931472, %v1291_v55  ;;  %v908_v47 = vadd.f32 %v892_v37, %v875_v21  ;;  %v936_v26 = vsel %vm575_vm2, %v907_v28, 0.0 }
 0x2d7   : > { %v927_v60 = vadd.f32 %v926_v20, %v925_v45  ;;  %v909_v34 = vadd.f32 %v893_v41, %v877_v17  ;;  %v938_v32 = vsel %vm575_vm2, %v908_v47, 0.0 }
 0x2d9   : > { %v929_v29 = vadd.f32 %v928_v11, %v927_v60  ;;  %v940_v52 = vsel %vm575_vm2, %v909_v34, 0.0 }
 0x2db   : > { %v931_v31 = vadd.f32 %v930_v54, %v929_v29 }
 0x2dd   : > { %v933_v18 = vadd.f32 %v932_v30, %v931_v31 }
 0x2df   : > { %v935_v1 = vadd.f32 %v934_v23, %v933_v18 }
 0x2e1   : > { %v937_v10 = vadd.f32 %v936_v26, %v935_v1 }
 0x2e3   : > { %v939_v58 = vadd.f32 %v938_v32, %v937_v10 }
 0x2e5   : > { %v941_v24 = vadd.f32 %v940_v52, %v939_v58 }
 0x2e7   : > { %v942_v16 = vrot.slane %v941_v24, 4 }
 0x2e9   : > { %v943_v2 = vadd.f32 %v942_v16, %v941_v24 }
 0x2eb   : > { %v944_v51 = vrot.slane %v943_v2, 2 }
 0x2ed   : > { %v945_v39 = vadd.f32 %v944_v51, %v943_v2 }
 0x2ef   : > { %v946_v50 = vrot.slane %v945_v39, 1 }
 0x2f1   : > { %v947_v44 = vadd.f32 %v946_v50, %v945_v39 }
 0x2f3   : > { %v948_v56 = vadd.f32 %v947_v44, %v910_v49 }
 0x2f5   : > { %950 = vst.msk [vmem:[#allocation6] sm:$0x1] %vm949_vm5, %v948_v56 }
 0x2f6 PF: > { %p951_p8 = scmp.eq.s32.totalorder %s1410_s15, 1  ;;  %p1066_p9 = scmp.ne.s32.totalorder %s1410_s15, 1 }
 0x2f8   : > { %954 = sbr.rel (%p1066_p9) target bundleno = 897 (0x381), region = 56 }
 0x2fd   : > { %v955_v63 = vld [vmem:[%s1916_s6] sm:$0x1]  ;;  %vm961_vm2 = vcmask 1040384   ;;  %v960_v43 = vld [vmem:[#allocation6] sm:$0x1]  ;;  %vm966_vm6 = vcmask 0  }
 0x2fe   : > { %1292 = vlog2.f32 %v955_v63  ;;  %v958_v42 = vld [vmem:[%s1841_s5] sm:$0x1] }
 0x304   : > { %v1293_v4 = vpop.eup %1292 }
 0x305   : > { %v957_v57 = vmul.f32 0.6931472, %v1293_v4 }
 0x307   : > { %v959_v38 = vadd.f32 %v958_v42, %v957_v57 }
 0x309   : > { %v962_v12 = vsel %vm961_vm2, %v959_v38, 0.0 }
 0x30a   : > { %963 = vadd.xlane.f32.xlu0 %v962_v12 }
 0x37d   : > { %v964_v7 = vpop.xlane.xlu0 %963 }
 0x37e   : > { %v965_v3 = vadd.f32 %v964_v7, %v960_v43 }
 0x380   : > { %967 = vst.msk [vmem:[#allocation6] sm:$0x1] %vm966_vm6, %v965_v3 }
 0x381 PF: > { %p968_p10 = pnand %p951_p8, %p826_p6 }
 0x383   : > { %971 = sbr.rel (%p968_p10) target bundleno = 908 (0x38c), region = 60 }
 0x388   : > { %v972_v0 = vld [vmem:[#allocation6] sm:$0x1]  ;;  %vm974_vm7 = vcmask 0  }
 0x389   : > { %v973_v6 = vmul.f32 0.00390625, %v972_v0 }
 0x38b   : > { %975 = vst.msk [vmem:[#allocation11] sm:$0x1] %vm974_vm7, %v973_v6 }
 0x38c PF: > { %p1083_p11 = scmp.eq.s32.totalorder %s1053_s0, 3  ;;  %s984_s9 = sshll.u32 %s2050_s2, 4  ;;  %s985_s9 = int_to_ptr.hbm [resolvable:$true] %s984_s9 }
 0x38d   : > { %s1433_s10 = smov [#allocation11]  }
 0x38e   : > { %s982_s11 = sshll.u32 %s1433_s10, 4  ;;  %s983_s11 = int_to_ptr.vmem [resolvable:$true] %s982_s11 }
 0x38f   : > { %1075 = dma.vmem_to_hbm [thread:$0]  (%p1083_p11), %s983_s11, 16, %s985_s9, [#allocation10]  }
 0x390   : > { %1389 = dma.done.wait (%p1083_p11), [#allocation10], 16  }
 0x391   : > { %1391 = vsyncadd (%p1083_p11), [#allocation10], 4294967280 }
 0x392 PF: > { %s17_s18 = sadd.s32 1, %s1422_s18   ;;  %s2088_s11 = smov %s1398_s12 }
 0x393   : > { %p14_p12 = scmp.ge.s32.totalorder %s17_s18, 6   ;;  %s2089_s12 = smov %s1402_s13 }
 0x394   : > { %s2090_s13 = smov %s1521_s30  ;;  %s2091_s14 = smov %s1414_s16 }
 0x395   : > { %s2092_s15 = smov %s1418_s17  ;;  %s2093_s16 = smov %s2096_s19 }
 0x396   : > { %s2094_s17 = smov %s2100_s20  ;;  %16 = sbr.rel (!%p14_p12) target bundleno = 8 (0x8), region = 97 }
 0x39b   :  { %998 = vsyncpa [#allocation9], 1 }
 0x39c   :  { %1000 = vsyncpa [#allocation9 + $0x1], 1 }
 0x39d   :  { %1001 = vsyncpa [#allocation10], 1 }
 0x39e   :  { %1003 = vsyncpa [#allocation10 + $0x1], 1 }

</bundles_post_ra>
